<compile_context>
chip_gen: v7x
topology: tpu7x:2x2x1
jax: 0.10.0
libtpu: 0.0.40
codegen_flags: <defaults>
</compile_context>

<pallas_src>
import jax
import jax.numpy as jnp
import numpy as np
from jax import lax
from jax.experimental import pallas as pl
from jax.experimental.pallas import tpu as pltpu


def hr_channel_shrink_spatial_upsample(x, params, *, upsample_rate,
                                       min_channels_of_a_grp=4, bn_eps=1e-5):
    """Pallas TPU forward of HRChannelShrinkSpatialUpsample (inference-mode BN).

    x: (N, C_in, H, W) float32 (NCHW, PyTorch convention).
    params: dict of PyTorch-layout tensors:
        w1 (Co,Ci,1,1)  b1 g1 be1 m1 v1 (Co,)   # conv1 + bn1
        w2 (Co,Co//G,3,3) b2 g2 be2 m2 v2       # grouped conv2 + bn2
        w3 (Co,Co,1,1)  b3 g3 be3 m3 v3         # conv3 + bn3
    Returns (N, C_out, H*r, W*r) float32.
    """
    n, cin, h, w = map(int, x.shape)
    cout = int(params["w1"].shape[0])
    r = int(upsample_rate)
    assert cout % min_channels_of_a_grp == 0
    groups = cout // min_channels_of_a_grp
    gsz = cout // groups                       # channels per group (in == out here)
    hw, ho, wo = h * w, h * r, w * r
    hwo = ho * wo

    f32 = np.float32

    # ---- Host-side folding: conv bias + inference BatchNorm -> scale/shift ----
    def fold_bn(conv_bias, gamma, beta, mean, var):
        scale = np.asarray(gamma, f32) / np.sqrt(np.asarray(var, f32) + bn_eps)
        shift = np.asarray(beta, f32) + (np.asarray(conv_bias, f32) - np.asarray(mean, f32)) * scale
        return scale, shift

    s1, b1f = fold_bn(params["b1"], params["g1"], params["be1"], params["m1"], params["v1"])
    s2, b2f = fold_bn(params["b2"], params["g2"], params["be2"], params["m2"], params["v2"])
    s3, b3f = fold_bn(params["b3"], params["g3"], params["be3"], params["m3"], params["v3"])

    w1f = np.asarray(params["w1"], f32)[:, :, 0, 0] * s1[:, None]          # (Co, Ci)
    w3f = np.asarray(params["w3"], f32)[:, :, 0, 0] * s3[:, None]          # (Co, Co)

    # Grouped 3x3 conv -> 9 dense block-diagonal (Co, Co) tap matrices (bn2 folded).
    w2 = np.asarray(params["w2"], f32)                                     # (Co, gsz, 3, 3)
    w2taps = np.zeros((9, cout, cout), f32)
    for co in range(cout):
        base = (co // gsz) * gsz
        for j in range(gsz):
            w2taps[:, co, base + j] = (w2[co, j] * s2[co]).reshape(9)      # k = ky*3 + kx

    # Per-tap lane shifts (flat p = h*W + w) and 0/1 boundary masks (zero padding).
    yy, xx = np.meshgrid(np.arange(h), np.arange(w), indexing="ij")
    masks = np.zeros((9, 1, hw), f32)
    shifts = []
    for ky in range(3):
        for kx in range(3):
            dy, dx = ky - 1, kx - 1
            valid = (yy + dy >= 0) & (yy + dy < h) & (xx + dx >= 0) & (xx + dx < w)
            masks[ky * 3 + kx, 0] = valid.reshape(-1).astype(f32)
            shifts.append((-(dy * w + dx)) % hw)

    # One-hot nearest-upsample expansion matrix: out[:, p] = y[:, src(p)]. Exact.
    pp = np.arange(hwo)
    src = (pp // wo // r) * w + (pp % wo) // r
    expand = np.zeros((hw, hwo), f32)
    expand[src, pp] = 1.0

    def kernel(x_ref, w1_ref, b1_ref, w2_ref, b2_ref, m_ref, w3_ref, b3_ref, e_ref, o_ref):
        xb = x_ref[0]                                                      # (Ci, HW), lane-dense
        # conv1 (1x1) + bn1 + relu
        y1 = jnp.dot(w1_ref[...], xb, preferred_element_type=jnp.float32) + b1_ref[...]
        y1 = jnp.maximum(y1, 0.0)
        # conv2 (3x3 grouped, padding=1) + bn2: 9 lane-rolled, masked, block-diag taps
        acc = jnp.zeros((cout, hw), jnp.float32)
        for k, sh in enumerate(shifts):
            if sh == 0:
                win = y1                               # center tap: no shift, mask is all-ones
            else:
                win = pltpu.roll(y1, shift=sh, axis=1) * m_ref[k]
            acc = acc + jnp.dot(w2_ref[k], win, preferred_element_type=jnp.float32)
        y2 = acc + b2_ref[...]
        # conv3 (1x1) + bn3 + relu
        y3 = jnp.dot(w3_ref[...], y2, preferred_element_type=jnp.float32) + b3_ref[...]
        y3 = jnp.maximum(y3, 0.0)
        # nearest upsample via one-hot expansion; single dense lane-aligned store
        o_ref[0] = jnp.dot(y3, e_ref[...], preferred_element_type=jnp.float32).astype(o_ref.dtype)

    ins = (
        jnp.asarray(x, jnp.float32).reshape(n, cin, hw),   # NCHW with spatial flattened on lanes
        jnp.asarray(w1f),
        jnp.asarray(b1f.reshape(cout, 1)),
        jnp.asarray(w2taps),
        jnp.asarray(b2f.reshape(cout, 1)),
        jnp.asarray(masks),
        jnp.asarray(w3f),
        jnp.asarray(b3f.reshape(cout, 1)),
        jnp.asarray(expand),
    )
    in_specs = [
        pl.BlockSpec((1, cin, hw), lambda i: (i, 0, 0)),
        pl.BlockSpec((cout, cin), lambda i: (0, 0)),
        pl.BlockSpec((cout, 1), lambda i: (0, 0)),
        pl.BlockSpec((9, cout, cout), lambda i: (0, 0, 0)),
        pl.BlockSpec((cout, 1), lambda i: (0, 0)),
        pl.BlockSpec((9, 1, hw), lambda i: (0, 0, 0)),
        pl.BlockSpec((cout, cout), lambda i: (0, 0)),
        pl.BlockSpec((cout, 1), lambda i: (0, 0)),
        pl.BlockSpec((hw, hwo), lambda i: (0, 0)),
    ]

    flops = 2 * n * hw * cout * (cin + 9 * cout + cout) + 2 * n * cout * hw * hwo
    bytes_accessed = int(sum(int(a.size) for a in ins) * 4 + n * cout * hwo * 4)

    out = pl.pallas_call(
        kernel,
        out_shape=jax.ShapeDtypeStruct((n, cout, hwo), jnp.float32),
        grid=(n,),
        in_specs=in_specs,
        out_specs=pl.BlockSpec((1, cout, hwo), lambda i: (i, 0, 0)),
        compiler_params=pltpu.CompilerParams(
            dimension_semantics=("parallel",),
            vmem_limit_bytes=32 * 1024 * 1024,
        ),
        cost_estimate=pl.CostEstimate(flops=int(flops), transcendentals=0,
                                      bytes_accessed=bytes_accessed),
    )(*ins)

    return out.reshape(n, cout, ho, wo)


# ---------------------------- pure-JAX reference ----------------------------
def _bn(y, gamma, beta, mean, var, eps=1e-5):
    inv = gamma / jnp.sqrt(var + eps)
    return (y - mean[None, :, None, None]) * inv[None, :, None, None] + beta[None, :, None, None]


def _reference(x, p, upsample_rate, groups):
    dn = ("NCHW", "OIHW", "NCHW")
    hi = lax.Precision.HIGHEST
    y = lax.conv_general_dilated(x, p["w1"], (1, 1), "VALID", dimension_numbers=dn,
                                 precision=hi) + p["b1"][None, :, None, None]
    y = jnp.maximum(_bn(y, p["g1"], p["be1"], p["m1"], p["v1"]), 0.0)
    y = lax.conv_general_dilated(y, p["w2"], (1, 1), ((1, 1), (1, 1)), dimension_numbers=dn,
                                 feature_group_count=groups, precision=hi) + p["b2"][None, :, None, None]
    y = _bn(y, p["g2"], p["be2"], p["m2"], p["v2"])
    y = lax.conv_general_dilated(y, p["w3"], (1, 1), "VALID", dimension_numbers=dn,
                                 precision=hi) + p["b3"][None, :, None, None]
    y = jnp.maximum(_bn(y, p["g3"], p["be3"], p["m3"], p["v3"]), 0.0)
    r = upsample_rate
    return jnp.repeat(jnp.repeat(y, r, axis=2), r, axis=3)


if __name__ == "__main__":
    N, CIN, COUT, H, W = 2, 32, 16, 16, 16       # "channel shrink": 32 -> 16 channels
    RATE, MIN_G = 2, 4
    GROUPS = COUT // MIN_G

    keys = jax.random.split(jax.random.PRNGKey(0), 20)
    x = jax.random.normal(keys[0], (N, CIN, H, W), dtype=jnp.float32)

    def nrm(k, shape, scale=1.0):
        return (jax.random.normal(k, shape, jnp.float32) * scale).astype(jnp.float32)

    def uni(k, shape, lo, hi):
        return jax.random.uniform(k, shape, jnp.float32, lo, hi)

    params = dict(
        w1=nrm(keys[1], (COUT, CIN, 1, 1), 1.0 / np.sqrt(CIN)),
        b1=nrm(keys[2], (COUT,), 0.1),
        g1=uni(keys[3], (COUT,), 0.5, 1.5),
        be1=nrm(keys[4], (COUT,), 0.1),
        m1=nrm(keys[5], (COUT,), 0.1),
        v1=uni(keys[6], (COUT,), 0.5, 1.5),
        w2=nrm(keys[7], (COUT, MIN_G, 3, 3), 1.0 / np.sqrt(9 * MIN_G)),
        b2=nrm(keys[8], (COUT,), 0.1),
        g2=uni(keys[9], (COUT,), 0.5, 1.5),
        be2=nrm(keys[10], (COUT,), 0.1),
        m2=nrm(keys[11], (COUT,), 0.1),
        v2=uni(keys[12], (COUT,), 0.5, 1.5),
        w3=nrm(keys[13], (COUT, COUT, 1, 1), 1.0 / np.sqrt(COUT)),
        b3=nrm(keys[14], (COUT,), 0.1),
        g3=uni(keys[15], (COUT,), 0.5, 1.5),
        be3=nrm(keys[16], (COUT,), 0.1),
        m3=nrm(keys[17], (COUT,), 0.1),
        v3=uni(keys[18], (COUT,), 0.5, 1.5),
    )

    out = hr_channel_shrink_spatial_upsample(
        x, params, upsample_rate=RATE, min_channels_of_a_grp=MIN_G)
    out = jax.block_until_ready(out)

    ref = _reference(x, params, RATE, GROUPS)
    assert out.shape == (N, COUT, H * RATE, W * RATE), out.shape
    np.testing.assert_allclose(np.asarray(out), np.asarray(ref), rtol=2e-2, atol=2e-2)

    print("KERNEL_OK")
</pallas_src>

<mosaic_0001>
module attributes {stable_mosaic.version = 11 : i64} {
  func.func @kernel(%arg0: i32, %arg1: memref<1x32x256xf32, #tpu.memory_space<vmem>>, %arg2: memref<16x32xf32, #tpu.memory_space<vmem>>, %arg3: memref<16x1xf32, #tpu.memory_space<vmem>>, %arg4: memref<9x16x16xf32, #tpu.memory_space<vmem>>, %arg5: memref<16x1xf32, #tpu.memory_space<vmem>>, %arg6: memref<9x1x256xf32, #tpu.memory_space<vmem>>, %arg7: memref<16x16xf32, #tpu.memory_space<vmem>>, %arg8: memref<16x1xf32, #tpu.memory_space<vmem>>, %arg9: memref<256x1024xf32, #tpu.memory_space<vmem>>, %arg10: memref<1x16x1024xf32, #tpu.memory_space<vmem>>) attributes {dimension_semantics = [#tpu.dimension_semantics<parallel>], iteration_bounds = array<i64: 2>, scalar_prefetch = 0 : i64, scratch_operands = 0 : i64, tpu.core_type = #tpu.core_type<tc>, window_params = [{transform_indices = @transform_0, window_bounds = array<i64: 1, 32, 256>}, {pipeline_mode = #tpu.pipeline_mode<synchronous>, transform_indices = @transform_1, window_bounds = array<i64: 16, 32>}, {pipeline_mode = #tpu.pipeline_mode<synchronous>, transform_indices = @transform_2, window_bounds = array<i64: 16, 1>}, {pipeline_mode = #tpu.pipeline_mode<synchronous>, transform_indices = @transform_3, window_bounds = array<i64: 9, 16, 16>}, {pipeline_mode = #tpu.pipeline_mode<synchronous>, transform_indices = @transform_4, window_bounds = array<i64: 16, 1>}, {pipeline_mode = #tpu.pipeline_mode<synchronous>, transform_indices = @transform_5, window_bounds = array<i64: 9, 1, 256>}, {pipeline_mode = #tpu.pipeline_mode<synchronous>, transform_indices = @transform_6, window_bounds = array<i64: 16, 16>}, {pipeline_mode = #tpu.pipeline_mode<synchronous>, transform_indices = @transform_7, window_bounds = array<i64: 16, 1>}, {pipeline_mode = #tpu.pipeline_mode<synchronous>, transform_indices = @transform_8, window_bounds = array<i64: 256, 1024>}, {transform_indices = @transform_9, window_bounds = array<i64: 1, 16, 1024>}]} {
    %c0 = arith.constant 0 : index
    %c0_0 = arith.constant 0 : index
    %c0_1 = arith.constant 0 : index
    %0 = vector.load %arg1[%c0, %c0_0, %c0_1] : memref<1x32x256xf32, #tpu.memory_space<vmem>>, vector<1x32x256xf32>
    %1 = vector.shape_cast %0 : vector<1x32x256xf32> to vector<32x256xf32>
    %c0_2 = arith.constant 0 : index
    %c0_3 = arith.constant 0 : index
    %2 = vector.load %arg2[%c0_2, %c0_3] : memref<16x32xf32, #tpu.memory_space<vmem>>, vector<16x32xf32>
    %cst = arith.constant dense<0.000000e+00> : vector<16x256xf32>
    %3 = tpu.matmul %2, %1, %cst {dimension_numbers = #tpu.dot_dimension_numbers<[1], [0], [0], [1], [0, 0, 1, 1], [], []>} : vector<16x32xf32>, vector<32x256xf32>, vector<16x256xf32> -> vector<16x256xf32>
    %c0_4 = arith.constant 0 : index
    %c0_5 = arith.constant 0 : index
    %4 = vector.load %arg3[%c0_4, %c0_5] : memref<16x1xf32, #tpu.memory_space<vmem>>, vector<16x1xf32>
    %5 = vector.broadcast %4 : vector<16x1xf32> to vector<16x256xf32>
    %6 = arith.addf %3, %5 : vector<16x256xf32>
    %cst_6 = arith.constant 0.000000e+00 : f32
    %7 = vector.broadcast %cst_6 : f32 to vector<16x256xf32>
    %8 = arith.maximumf %6, %7 : vector<16x256xf32>
    %cst_7 = arith.constant 0.000000e+00 : f32
    %9 = vector.broadcast %cst_7 : f32 to vector<16x256xf32>
    %c17_i32 = arith.constant 17 : i32
    %10 = tpu.dynamic_rotate %8 by %c17_i32 dim 1 : vector<16x256xf32>, i32 -> vector<16x256xf32>
    %c0_8 = arith.constant 0 : index
    %c0_9 = arith.constant 0 : index
    %c0_10 = arith.constant 0 : index
    %11 = vector.load %arg6[%c0_8, %c0_9, %c0_10] : memref<9x1x256xf32, #tpu.memory_space<vmem>>, vector<1x1x256xf32>
    %12 = vector.shape_cast %11 : vector<1x1x256xf32> to vector<1x256xf32>
    %13 = vector.broadcast %12 : vector<1x256xf32> to vector<16x256xf32>
    %14 = arith.mulf %10, %13 : vector<16x256xf32>
    %c0_11 = arith.constant 0 : index
    %c0_12 = arith.constant 0 : index
    %c0_13 = arith.constant 0 : index
    %15 = vector.load %arg4[%c0_11, %c0_12, %c0_13] : memref<9x16x16xf32, #tpu.memory_space<vmem>>, vector<1x16x16xf32>
    %16 = vector.shape_cast %15 : vector<1x16x16xf32> to vector<16x16xf32>
    %cst_14 = arith.constant dense<0.000000e+00> : vector<16x256xf32>
    %17 = tpu.matmul %16, %14, %cst_14 {dimension_numbers = #tpu.dot_dimension_numbers<[1], [0], [0], [1], [0, 0, 1, 1], [], []>} : vector<16x16xf32>, vector<16x256xf32>, vector<16x256xf32> -> vector<16x256xf32>
    %18 = arith.addf %9, %17 : vector<16x256xf32>
    %c16_i32 = arith.constant 16 : i32
    %19 = tpu.dynamic_rotate %8 by %c16_i32 dim 1 : vector<16x256xf32>, i32 -> vector<16x256xf32>
    %c1 = arith.constant 1 : index
    %c0_15 = arith.constant 0 : index
    %c0_16 = arith.constant 0 : index
    %20 = vector.load %arg6[%c1, %c0_15, %c0_16] : memref<9x1x256xf32, #tpu.memory_space<vmem>>, vector<1x1x256xf32>
    %21 = vector.shape_cast %20 : vector<1x1x256xf32> to vector<1x256xf32>
    %22 = vector.broadcast %21 : vector<1x256xf32> to vector<16x256xf32>
    %23 = arith.mulf %19, %22 : vector<16x256xf32>
    %c1_17 = arith.constant 1 : index
    %c0_18 = arith.constant 0 : index
    %c0_19 = arith.constant 0 : index
    %24 = vector.load %arg4[%c1_17, %c0_18, %c0_19] : memref<9x16x16xf32, #tpu.memory_space<vmem>>, vector<1x16x16xf32>
    %25 = vector.shape_cast %24 : vector<1x16x16xf32> to vector<16x16xf32>
    %cst_20 = arith.constant dense<0.000000e+00> : vector<16x256xf32>
    %26 = tpu.matmul %25, %23, %cst_20 {dimension_numbers = #tpu.dot_dimension_numbers<[1], [0], [0], [1], [0, 0, 1, 1], [], []>} : vector<16x16xf32>, vector<16x256xf32>, vector<16x256xf32> -> vector<16x256xf32>
    %27 = arith.addf %18, %26 : vector<16x256xf32>
    %c15_i32 = arith.constant 15 : i32
    %28 = tpu.dynamic_rotate %8 by %c15_i32 dim 1 : vector<16x256xf32>, i32 -> vector<16x256xf32>
    %c2 = arith.constant 2 : index
    %c0_21 = arith.constant 0 : index
    %c0_22 = arith.constant 0 : index
    %29 = vector.load %arg6[%c2, %c0_21, %c0_22] : memref<9x1x256xf32, #tpu.memory_space<vmem>>, vector<1x1x256xf32>
    %30 = vector.shape_cast %29 : vector<1x1x256xf32> to vector<1x256xf32>
    %31 = vector.broadcast %30 : vector<1x256xf32> to vector<16x256xf32>
    %32 = arith.mulf %28, %31 : vector<16x256xf32>
    %c2_23 = arith.constant 2 : index
    %c0_24 = arith.constant 0 : index
    %c0_25 = arith.constant 0 : index
    %33 = vector.load %arg4[%c2_23, %c0_24, %c0_25] : memref<9x16x16xf32, #tpu.memory_space<vmem>>, vector<1x16x16xf32>
    %34 = vector.shape_cast %33 : vector<1x16x16xf32> to vector<16x16xf32>
    %cst_26 = arith.constant dense<0.000000e+00> : vector<16x256xf32>
    %35 = tpu.matmul %34, %32, %cst_26 {dimension_numbers = #tpu.dot_dimension_numbers<[1], [0], [0], [1], [0, 0, 1, 1], [], []>} : vector<16x16xf32>, vector<16x256xf32>, vector<16x256xf32> -> vector<16x256xf32>
    %36 = arith.addf %27, %35 : vector<16x256xf32>
    %c1_i32 = arith.constant 1 : i32
    %37 = tpu.dynamic_rotate %8 by %c1_i32 dim 1 : vector<16x256xf32>, i32 -> vector<16x256xf32>
    %c3 = arith.constant 3 : index
    %c0_27 = arith.constant 0 : index
    %c0_28 = arith.constant 0 : index
    %38 = vector.load %arg6[%c3, %c0_27, %c0_28] : memref<9x1x256xf32, #tpu.memory_space<vmem>>, vector<1x1x256xf32>
    %39 = vector.shape_cast %38 : vector<1x1x256xf32> to vector<1x256xf32>
    %40 = vector.broadcast %39 : vector<1x256xf32> to vector<16x256xf32>
    %41 = arith.mulf %37, %40 : vector<16x256xf32>
    %c3_29 = arith.constant 3 : index
    %c0_30 = arith.constant 0 : index
    %c0_31 = arith.constant 0 : index
    %42 = vector.load %arg4[%c3_29, %c0_30, %c0_31] : memref<9x16x16xf32, #tpu.memory_space<vmem>>, vector<1x16x16xf32>
    %43 = vector.shape_cast %42 : vector<1x16x16xf32> to vector<16x16xf32>
    %cst_32 = arith.constant dense<0.000000e+00> : vector<16x256xf32>
    %44 = tpu.matmul %43, %41, %cst_32 {dimension_numbers = #tpu.dot_dimension_numbers<[1], [0], [0], [1], [0, 0, 1, 1], [], []>} : vector<16x16xf32>, vector<16x256xf32>, vector<16x256xf32> -> vector<16x256xf32>
    %45 = arith.addf %36, %44 : vector<16x256xf32>
    %c4 = arith.constant 4 : index
    %c0_33 = arith.constant 0 : index
    %c0_34 = arith.constant 0 : index
    %46 = vector.load %arg4[%c4, %c0_33, %c0_34] : memref<9x16x16xf32, #tpu.memory_space<vmem>>, vector<1x16x16xf32>
    %47 = vector.shape_cast %46 : vector<1x16x16xf32> to vector<16x16xf32>
    %cst_35 = arith.constant dense<0.000000e+00> : vector<16x256xf32>
    %48 = tpu.matmul %47, %8, %cst_35 {dimension_numbers = #tpu.dot_dimension_numbers<[1], [0], [0], [1], [0, 0, 1, 1], [], []>} : vector<16x16xf32>, vector<16x256xf32>, vector<16x256xf32> -> vector<16x256xf32>
    %49 = arith.addf %45, %48 : vector<16x256xf32>
    %c255_i32 = arith.constant 255 : i32
    %50 = tpu.dynamic_rotate %8 by %c255_i32 dim 1 : vector<16x256xf32>, i32 -> vector<16x256xf32>
    %c5 = arith.constant 5 : index
    %c0_36 = arith.constant 0 : index
    %c0_37 = arith.constant 0 : index
    %51 = vector.load %arg6[%c5, %c0_36, %c0_37] : memref<9x1x256xf32, #tpu.memory_space<vmem>>, vector<1x1x256xf32>
    %52 = vector.shape_cast %51 : vector<1x1x256xf32> to vector<1x256xf32>
    %53 = vector.broadcast %52 : vector<1x256xf32> to vector<16x256xf32>
    %54 = arith.mulf %50, %53 : vector<16x256xf32>
    %c5_38 = arith.constant 5 : index
    %c0_39 = arith.constant 0 : index
    %c0_40 = arith.constant 0 : index
    %55 = vector.load %arg4[%c5_38, %c0_39, %c0_40] : memref<9x16x16xf32, #tpu.memory_space<vmem>>, vector<1x16x16xf32>
    %56 = vector.shape_cast %55 : vector<1x16x16xf32> to vector<16x16xf32>
    %cst_41 = arith.constant dense<0.000000e+00> : vector<16x256xf32>
    %57 = tpu.matmul %56, %54, %cst_41 {dimension_numbers = #tpu.dot_dimension_numbers<[1], [0], [0], [1], [0, 0, 1, 1], [], []>} : vector<16x16xf32>, vector<16x256xf32>, vector<16x256xf32> -> vector<16x256xf32>
    %58 = arith.addf %49, %57 : vector<16x256xf32>
    %c241_i32 = arith.constant 241 : i32
    %59 = tpu.dynamic_rotate %8 by %c241_i32 dim 1 : vector<16x256xf32>, i32 -> vector<16x256xf32>
    %c6 = arith.constant 6 : index
    %c0_42 = arith.constant 0 : index
    %c0_43 = arith.constant 0 : index
    %60 = vector.load %arg6[%c6, %c0_42, %c0_43] : memref<9x1x256xf32, #tpu.memory_space<vmem>>, vector<1x1x256xf32>
    %61 = vector.shape_cast %60 : vector<1x1x256xf32> to vector<1x256xf32>
    %62 = vector.broadcast %61 : vector<1x256xf32> to vector<16x256xf32>
    %63 = arith.mulf %59, %62 : vector<16x256xf32>
    %c6_44 = arith.constant 6 : index
    %c0_45 = arith.constant 0 : index
    %c0_46 = arith.constant 0 : index
    %64 = vector.load %arg4[%c6_44, %c0_45, %c0_46] : memref<9x16x16xf32, #tpu.memory_space<vmem>>, vector<1x16x16xf32>
    %65 = vector.shape_cast %64 : vector<1x16x16xf32> to vector<16x16xf32>
    %cst_47 = arith.constant dense<0.000000e+00> : vector<16x256xf32>
    %66 = tpu.matmul %65, %63, %cst_47 {dimension_numbers = #tpu.dot_dimension_numbers<[1], [0], [0], [1], [0, 0, 1, 1], [], []>} : vector<16x16xf32>, vector<16x256xf32>, vector<16x256xf32> -> vector<16x256xf32>
    %67 = arith.addf %58, %66 : vector<16x256xf32>
    %c240_i32 = arith.constant 240 : i32
    %68 = tpu.dynamic_rotate %8 by %c240_i32 dim 1 : vector<16x256xf32>, i32 -> vector<16x256xf32>
    %c7 = arith.constant 7 : index
    %c0_48 = arith.constant 0 : index
    %c0_49 = arith.constant 0 : index
    %69 = vector.load %arg6[%c7, %c0_48, %c0_49] : memref<9x1x256xf32, #tpu.memory_space<vmem>>, vector<1x1x256xf32>
    %70 = vector.shape_cast %69 : vector<1x1x256xf32> to vector<1x256xf32>
    %71 = vector.broadcast %70 : vector<1x256xf32> to vector<16x256xf32>
    %72 = arith.mulf %68, %71 : vector<16x256xf32>
    %c7_50 = arith.constant 7 : index
    %c0_51 = arith.constant 0 : index
    %c0_52 = arith.constant 0 : index
    %73 = vector.load %arg4[%c7_50, %c0_51, %c0_52] : memref<9x16x16xf32, #tpu.memory_space<vmem>>, vector<1x16x16xf32>
    %74 = vector.shape_cast %73 : vector<1x16x16xf32> to vector<16x16xf32>
    %cst_53 = arith.constant dense<0.000000e+00> : vector<16x256xf32>
    %75 = tpu.matmul %74, %72, %cst_53 {dimension_numbers = #tpu.dot_dimension_numbers<[1], [0], [0], [1], [0, 0, 1, 1], [], []>} : vector<16x16xf32>, vector<16x256xf32>, vector<16x256xf32> -> vector<16x256xf32>
    %76 = arith.addf %67, %75 : vector<16x256xf32>
    %c239_i32 = arith.constant 239 : i32
    %77 = tpu.dynamic_rotate %8 by %c239_i32 dim 1 : vector<16x256xf32>, i32 -> vector<16x256xf32>
    %c8 = arith.constant 8 : index
    %c0_54 = arith.constant 0 : index
    %c0_55 = arith.constant 0 : index
    %78 = vector.load %arg6[%c8, %c0_54, %c0_55] : memref<9x1x256xf32, #tpu.memory_space<vmem>>, vector<1x1x256xf32>
    %79 = vector.shape_cast %78 : vector<1x1x256xf32> to vector<1x256xf32>
    %80 = vector.broadcast %79 : vector<1x256xf32> to vector<16x256xf32>
    %81 = arith.mulf %77, %80 : vector<16x256xf32>
    %c8_56 = arith.constant 8 : index
    %c0_57 = arith.constant 0 : index
    %c0_58 = arith.constant 0 : index
    %82 = vector.load %arg4[%c8_56, %c0_57, %c0_58] : memref<9x16x16xf32, #tpu.memory_space<vmem>>, vector<1x16x16xf32>
    %83 = vector.shape_cast %82 : vector<1x16x16xf32> to vector<16x16xf32>
    %cst_59 = arith.constant dense<0.000000e+00> : vector<16x256xf32>
    %84 = tpu.matmul %83, %81, %cst_59 {dimension_numbers = #tpu.dot_dimension_numbers<[1], [0], [0], [1], [0, 0, 1, 1], [], []>} : vector<16x16xf32>, vector<16x256xf32>, vector<16x256xf32> -> vector<16x256xf32>
    %85 = arith.addf %76, %84 : vector<16x256xf32>
    %c0_60 = arith.constant 0 : index
    %c0_61 = arith.constant 0 : index
    %86 = vector.load %arg5[%c0_60, %c0_61] : memref<16x1xf32, #tpu.memory_space<vmem>>, vector<16x1xf32>
    %87 = vector.broadcast %86 : vector<16x1xf32> to vector<16x256xf32>
    %88 = arith.addf %85, %87 : vector<16x256xf32>
    %c0_62 = arith.constant 0 : index
    %c0_63 = arith.constant 0 : index
    %89 = vector.load %arg7[%c0_62, %c0_63] : memref<16x16xf32, #tpu.memory_space<vmem>>, vector<16x16xf32>
    %cst_64 = arith.constant dense<0.000000e+00> : vector<16x256xf32>
    %90 = tpu.matmul %89, %88, %cst_64 {dimension_numbers = #tpu.dot_dimension_numbers<[1], [0], [0], [1], [0, 0, 1, 1], [], []>} : vector<16x16xf32>, vector<16x256xf32>, vector<16x256xf32> -> vector<16x256xf32>
    %c0_65 = arith.constant 0 : index
    %c0_66 = arith.constant 0 : index
    %91 = vector.load %arg8[%c0_65, %c0_66] : memref<16x1xf32, #tpu.memory_space<vmem>>, vector<16x1xf32>
    %92 = vector.broadcast %91 : vector<16x1xf32> to vector<16x256xf32>
    %93 = arith.addf %90, %92 : vector<16x256xf32>
    %cst_67 = arith.constant 0.000000e+00 : f32
    %94 = vector.broadcast %cst_67 : f32 to vector<16x256xf32>
    %95 = arith.maximumf %93, %94 : vector<16x256xf32>
    %c0_68 = arith.constant 0 : index
    %c0_69 = arith.constant 0 : index
    %96 = vector.load %arg9[%c0_68, %c0_69] : memref<256x1024xf32, #tpu.memory_space<vmem>>, vector<256x1024xf32>
    %cst_70 = arith.constant dense<0.000000e+00> : vector<16x1024xf32>
    %97 = tpu.matmul %95, %96, %cst_70 {dimension_numbers = #tpu.dot_dimension_numbers<[1], [0], [0], [1], [0, 0, 1, 1], [], []>} : vector<16x256xf32>, vector<256x1024xf32>, vector<16x1024xf32> -> vector<16x1024xf32>
    %c0_71 = arith.constant 0 : index
    %c0_72 = arith.constant 0 : index
    %c0_73 = arith.constant 0 : index
    %98 = vector.load %arg10[%c0_71, %c0_72, %c0_73] : memref<1x16x1024xf32, #tpu.memory_space<vmem>>, vector<1x16x1024xf32>
    %99 = vector.shape_cast %98 : vector<1x16x1024xf32> to vector<16x1024xf32>
    %100 = vector.shape_cast %97 : vector<16x1024xf32> to vector<1x16x1024xf32>
    tpu.vector_store %arg10[%c0_71, %c0_72, %c0_73], %100 {strides = array<i32>} : memref<1x16x1024xf32, #tpu.memory_space<vmem>>, vector<1x16x1024xf32>,
    return
  }
  func.func @transform_0(%arg0: i32) -> (i32, i32, i32) {
    %c0_i32 = arith.constant 0 : i32
    %c0_i32_0 = arith.constant 0 : i32
    %c0_i32_1 = arith.constant 0 : i32
    return %arg0, %c0_i32, %c0_i32_0 : i32, i32, i32
  }
  func.func @transform_1(%arg0: i32) -> (i32, i32) {
    %c0_i32 = arith.constant 0 : i32
    %c0_i32_0 = arith.constant 0 : i32
    %c0_i32_1 = arith.constant 0 : i32
    return %c0_i32, %c0_i32_0 : i32, i32
  }
  func.func @transform_2(%arg0: i32) -> (i32, i32) {
    %c0_i32 = arith.constant 0 : i32
    %c0_i32_0 = arith.constant 0 : i32
    %c0_i32_1 = arith.constant 0 : i32
    return %c0_i32, %c0_i32_0 : i32, i32
  }
  func.func @transform_3(%arg0: i32) -> (i32, i32, i32) {
    %c0_i32 = arith.constant 0 : i32
    %c0_i32_0 = arith.constant 0 : i32
    %c0_i32_1 = arith.constant 0 : i32
    %c0_i32_2 = arith.constant 0 : i32
    return %c0_i32, %c0_i32_0, %c0_i32_1 : i32, i32, i32
  }
  func.func @transform_4(%arg0: i32) -> (i32, i32) {
    %c0_i32 = arith.constant 0 : i32
    %c0_i32_0 = arith.constant 0 : i32
    %c0_i32_1 = arith.constant 0 : i32
    return %c0_i32, %c0_i32_0 : i32, i32
  }
  func.func @transform_5(%arg0: i32) -> (i32, i32, i32) {
    %c0_i32 = arith.constant 0 : i32
    %c0_i32_0 = arith.constant 0 : i32
    %c0_i32_1 = arith.constant 0 : i32
    %c0_i32_2 = arith.constant 0 : i32
    return %c0_i32, %c0_i32_0, %c0_i32_1 : i32, i32, i32
  }
  func.func @transform_6(%arg0: i32) -> (i32, i32) {
    %c0_i32 = arith.constant 0 : i32
    %c0_i32_0 = arith.constant 0 : i32
    %c0_i32_1 = arith.constant 0 : i32
    return %c0_i32, %c0_i32_0 : i32, i32
  }
  func.func @transform_7(%arg0: i32) -> (i32, i32) {
    %c0_i32 = arith.constant 0 : i32
    %c0_i32_0 = arith.constant 0 : i32
    %c0_i32_1 = arith.constant 0 : i32
    return %c0_i32, %c0_i32_0 : i32, i32
  }
  func.func @transform_8(%arg0: i32) -> (i32, i32) {
    %c0_i32 = arith.constant 0 : i32
    %c0_i32_0 = arith.constant 0 : i32
    %c0_i32_1 = arith.constant 0 : i32
    return %c0_i32, %c0_i32_0 : i32, i32
  }
  func.func @transform_9(%arg0: i32) -> (i32, i32, i32) {
    %c0_i32 = arith.constant 0 : i32
    %c0_i32_0 = arith.constant 0 : i32
    %c0_i32_1 = arith.constant 0 : i32
    return %arg0, %c0_i32, %c0_i32_0 : i32, i32, i32
  }
}

</mosaic_0001>

<bundles_post_ra>
// kernel: tpu_custom_call.1
= control target key start
LH: loop header
LB: loop body
LE: loop exit
PB: predicated region body
PF: predicated region fallthrough
CT: control target
= control target key end

     0   :  { %14 = vsyncpa [#allocation3], 0  ;;  %s3602_s0 = inlined_call_operand.hbm [shape: f32[2,32,256], index: 0, kind: input, shape index: {}]   ;;  %s3603_s1 = inlined_call_operand.vmem [shape: f32[16,32], index: 1, kind: input, shape index: {}]   ;;  %s3604_s2 = inlined_call_operand.vmem [shape: f32[16,1], index: 2, kind: input, shape index: {}]   ;;  %s3605_s3 = inlined_call_operand.hbm [shape: f32[9,16,16], index: 3, kind: input, shape index: {}]   ;;  %s3606_s4 = inlined_call_operand.vmem [shape: f32[16,1], index: 4, kind: input, shape index: {}]   ;;  %s3607_s5 = inlined_call_operand.vmem [shape: f32[9,1,256], index: 5, kind: input, shape index: {}]   ;;  %s3608_s6 = inlined_call_operand.vmem [shape: f32[16,16], index: 6, kind: input, shape index: {}]   ;;  %s3609_s7 = inlined_call_operand.vmem [shape: f32[16,1], index: 7, kind: input, shape index: {}]   ;;  %s3610_s8 = inlined_call_operand.hbm [shape: f32[256,1024], index: 8, kind: input, shape index: {}]   ;;  %s3611_s9 = inlined_call_operand.hbm [shape: f32[2,16,1024], index: 9, kind: output, shape index: {}]  }
   0x1   :  { %16 = vsyncpa [#allocation3 + $0x1], 0 }
   0x2   :  { %17 = vsyncpa [#allocation6], 0 }
   0x3   :  { %18 = vsyncpa [#allocation4], 0 }
   0x4   :  { %20 = vsyncpa [#allocation4 + $0x1], 0  ;;  %s3038_s30 = smov 0   ;;  %s3040_s10 = smov 0  }
   0x5   :  { %s3042_s11 = smov 0   ;;  %s3044_s12 = smov 0  }
   0x6 LB: > { %s3059_s13 = sadd.s32 4294967295, %s2964_s12   ;;  %s2336_s14 = sadd.s32 4294967294, %s2964_s12   ;;  %s2964_s12 = sphi %s3044_s12, %s3634_s12   ;;  %s2960_s11 = sphi %s3042_s11, %s3633_s11   ;;  %s2956_s10 = sphi %s3040_s10, %s3632_s10   ;;  %s2952_s30 = sphi %s3038_s30, %s3631_s30  }
   0x7   : > { %p46_p0 = scmp.ne.s32.totalorder %s2956_s10, %s2952_s30  ;;  %p3612_p1 = scmp.eq.s32.totalorder %s3059_s13, 0 }
   0x8   : > { %p244_p3 = scmp.eq.s32.totalorder %s2336_s14, 1  ;;  %p2337_p5 = scmp.ge.s32.totalorder %s2964_s12, 1 }
   0x9   : > { %p3068_p4 = por %p3612_p1, %p46_p0  ;;  %p251_p7 = scmp.lt.s32.totalorder %s2964_s12, 3 }
   0xa   : > { %p3073_p6 = por %p244_p3, %p46_p0  ;;  %s2966_s18 = smov [#allocation5]  }
   0xb   : > { %s3616_s15 = scalar_select %p3068_p4, 1, 0 }
   0xc   : > { %s3617_s16 = scalar_select %p3073_p6, 1, 0 }
   0xd   : > { %p3078_p8 = pnand %p2337_p5, %p251_p7  ;;  %s269_s19 = sshll.u32 %s2966_s18, 4  ;;  %s3082_s19 = int_to_ptr.vmem [resolvable:$true] %s269_s19 }
   0xe   : > { %3618 = sst [smem:[#allocation12_spill]] %s3617_s16  ;;  %s2967_s21 = smov [#allocation7]  }
   0xf   : > { %p2733_p9 = pneg %p3078_p8  ;;  %s294_s22 = sshll.u32 %s2967_s21, 4  ;;  %s3093_s22 = int_to_ptr.vmem [resolvable:$true] %s294_s22 }
  0x10   : > { %s2808_s25 = scalar_lea.hbm %s3605_s3, 2304 }
  0x11   : > { %p3089_p11 = pnand %p2733_p9, %p3612_p1  ;;  %p2809_p12 = scmp.ne.s32.totalorder %s3605_s3, %s2808_s25 }
  0x12   : > { %p2815_p5 = scmp.lt.u32.totalorder %s2808_s25, %s3605_s3 }
  0x13   : > { %p2810_p13 = pneg %p3089_p11 }
  0x15   : > { %p2811_p0 = pnand %p2810_p13, %p2809_p12 }
  0x17   : > { %p2812_p3 = pneg %p2811_p0 }
  0x19   : > { %p2817_p7 = pnand %p2815_p5, %p2812_p3 }
  0x1b   : > { %2820 = shalt.err (!%p2817_p7)
}
  0x1c   : > { %s2821_s14 = scalar_lea.vmem %s3082_s19, 2304  ;;  %p2829_p2 = scmp.lt.s32.totalorder %s3082_s19, %s3082_s19 }
  0x1d   : > { %p2822_p9 = scmp.ne.s32.totalorder %s3082_s19, %s2821_s14  ;;  %p2830_p12 = scmp.lt.s32.totalorder %s2821_s14, %s2821_s14 }
  0x1f   : > { %p2824_p10 = pnand %p2822_p9, %p2810_p13  ;;  %p2831_p0 = por %p2830_p12, %p2829_p2 }
  0x21   : > { %p2825_p1 = pneg %p2824_p10 }
  0x23   : > { %p2832_p6 = pnand %p2831_p0, %p2825_p1 }
  0x25   : > { %2835 = shalt.err (!%p2832_p6)
}
  0x26   : > { %s2968_s18 = smov 128   ;;  %s2969_s21 = smov 8  }
  0x27   : > { %2736 = dma.hbm_to_vmem [thread:$0]  (!%p3089_p11), %s3605_s3, 2304, %s3082_s19, [#allocation6], %s2968_s18, %s2968_s18, %s2969_s21  }
  0x28   : > { %s2836_s27 = scalar_lea.hbm %s3610_s8, 32768 }
  0x29   : > { %p2837_p2 = scmp.ne.s32.totalorder %s3610_s8, %s2836_s27  ;;  %p2843_p10 = scmp.lt.u32.totalorder %s2836_s27, %s3610_s8 }
  0x2b   : > { %p2839_p1 = pnand %p2837_p2, %p2810_p13 }
  0x2d   : > { %p2840_p6 = pneg %p2839_p1 }
  0x2f   : > { %p2845_p3 = pnand %p2843_p10, %p2840_p6 }
  0x31   : > { %2848 = shalt.err (!%p2845_p3)
}
  0x32   : > { %s2849_s19 = scalar_lea.vmem %s3093_s22, 32768  ;;  %p2857_p12 = scmp.lt.s32.totalorder %s3093_s22, %s3093_s22 }
  0x33   : > { %p2850_p5 = scmp.ne.s32.totalorder %s3093_s22, %s2849_s19  ;;  %p2858_p0 = scmp.lt.s32.totalorder %s2849_s19, %s2849_s19 }
  0x35   : > { %p2852_p7 = pnand %p2850_p5, %p2810_p13  ;;  %p2859_p2 = por %p2858_p0, %p2857_p12 }
  0x37   : > { %p2853_p9 = pneg %p2852_p7 }
  0x39   : > { %p2860_p1 = pnand %p2859_p2, %p2853_p9 }
  0x3b   : > { %2863 = shalt.err (!%p2860_p1)
}
  0x3c   : > { %s2970_s16 = smov 1024   ;;  %s2971_s18 = smov 64  }
  0x3d   : > { %2739 = dma.hbm_to_vmem [thread:$0]  (!%p3089_p11), %s3610_s8, 32768, %s3093_s22, [#allocation6], %s2970_s16, %s2970_s16, %s2971_s18  }
  0x3e   : > { %s3148_s24 = sadd.s32 1, %s2964_s12   ;;  %s33_s26 = sadd.s32 1, %s2960_s11 }
  0x3f   : > { %s30_s25 = ssub.s32 %s2964_s12, %s3148_s24  ;;  %p40_p6 = scmp.ne.s32.totalorder %s2960_s11, %s2956_s10 }
  0x40   : > { %p31_p13 = scmp.eq.s32.totalorder %s30_s25, 0  ;;  %p41_p10 = scmp.eq.s32.totalorder %s2964_s12, 0 }
  0x41   : > { %p3621_p5 = scmp.eq.s32.totalorder %s3059_s13, 1  ;;  %p2750_p9 = scmp.lt.s32.totalorder %s2964_s12, 2 }
  0x42   : > { %s3157_s27 = scalar_select %p31_p13, %s2960_s11, %s33_s26  }
  0x43   : > { %p42_p3 = por %p41_p10, %p40_p6  ;;  %p3161_p7 = por %p3621_p5, %p40_p6 }
  0x44   : > { %s308_s20 = sand.u32 1, %s2960_s11   ;;  %s2383_s22 = sshll.u32 %s2964_s12, 10 }
  0x45   : > { %s3622_s28 = scalar_select %p3161_p7, 1, 0 }
  0x46   : > { %s2341_s29 = sshll.u32 %s308_s20, 6  ;;  %s3171_s16 = scalar_lea.hbm %s3602_s0, %s2383_s22 }
  0x47   : > { %s312_s18 = scalar_lea.vmem [#allocation2], %s2341_s29  ;;  %p3175_p11 = pnand %p2750_p9, %p42_p3 }
  0x48   : > { %s319_s21 = sshll.u32 %s312_s18, 4  ;;  %s3179_s25 = scalar_lea.sflag [#allocation3], %s308_s20  ;;  %s3173_s21 = int_to_ptr.vmem [resolvable:$true] %s319_s21 }
  0x49   : > { %s2864_s26 = scalar_lea.hbm %s3171_s16, 1024  ;;  %p2866_p0 = pneg %p3175_p11 }
  0x4a   : > { %p2865_p12 = scmp.ne.s32.totalorder %s3171_s16, %s2864_s26  ;;  %s2869_s14 = scalar_lea.hbm %s3602_s0, 2048 }
  0x4b   : > { %p2870_p13 = scmp.lt.u32.totalorder %s3171_s16, %s3602_s0  ;;  %p2871_p6 = scmp.lt.u32.totalorder %s2869_s14, %s2864_s26 }
  0x4c   : > { %p2867_p2 = pnand %p2866_p0, %p2865_p12  ;;  %p2873_p3 = scmp.lt.u32.totalorder %s2864_s26, %s3171_s16 }
  0x4d   : > { %p2872_p10 = por %p2871_p6, %p2870_p13 }
  0x4e   : > { %p2868_p1 = pneg %p2867_p2 }
  0x4f   : > { %p2874_p5 = por %p2873_p3, %p2872_p10 }
  0x51   : > { %p2875_p9 = pnand %p2874_p5, %p2868_p1 }
  0x53   : > { %2878 = shalt.err (!%p2875_p9)
}
  0x54   : > { %s2879_s20 = scalar_lea.vmem %s3173_s21, 1024  ;;  %s2972_s29 = smov [#allocation2]  }
  0x55   : > { %p2880_p12 = scmp.ne.s32.totalorder %s3173_s21, %s2879_s20  ;;  %s2884_s22 = sshll.u32 %s2972_s29, 4  ;;  %s2885_s22 = int_to_ptr.vmem [resolvable:$false] %s2884_s22 }
  0x56   : > { %s2886_s19 = scalar_lea.vmem %s2885_s22, 2048  ;;  %p2887_p4 = scmp.lt.s32.totalorder %s3173_s21, %s2885_s22 }
  0x57   : > { %p2882_p2 = pnand %p2880_p12, %p2866_p0  ;;  %p2888_p13 = scmp.lt.s32.totalorder %s2886_s19, %s2879_s20 }
  0x59   : > { %p2883_p7 = pneg %p2882_p2  ;;  %p2889_p6 = por %p2888_p13, %p2887_p4 }
  0x5b   : > { %p2890_p10 = pnand %p2889_p6, %p2883_p7 }
  0x5d   : > { %2893 = shalt.err (!%p2890_p10)
}
  0x5e   : > { %s2973_s26 = smov 256   ;;  %s2974_s14 = smov 16  }
  0x5f   : > { %2743 = dma.hbm_to_vmem [thread:$0]  (!%p3175_p11), %s3171_s16, 1024, %s3173_s21, %s3179_s25, %s2973_s26, %s2973_s26, %s2974_s14  }
  0x60   : > { %331 = sbr.rel (%p3078_p8) target bundleno = 1264 (0x4f0), region = 56  ;;  %s3210_s18 = sand.u32 (!%p3078_p8), 1, %s2956_s10  }
  0x61   : > { %s2345_s20 = sshll.u32 (!%p3078_p8), %s3210_s18, 6  ;;  %s334_s29 = scalar_lea.sflag (!%p3078_p8), [#allocation3], %s3210_s18 }
  0x62   : > { %s337_s22 = scalar_lea.vmem (!%p3078_p8), [#allocation2], %s2345_s20  ;;  %p3624_p4 = scmp.ne.s32.totalorder (!%p3078_p8), %s3616_s15, 0 }
  0x67   : > { %2939 = dma.done.wait (%p3624_p4), %s334_s29, 1024  }
  0x68   : > { %2941 = vsyncadd (%p3624_p4), %s334_s29, 4294966272  ;;  %p3625_p7 = scmp.eq.s32.totalorder %s3059_s13, 0 }
  0x6a   : > { %2943 = dma.done.wait (%p3625_p7), [#allocation6], 35072   ;;  %p3626_p11 = pmov %p3625_p7 }
  0x6b   : > { %v2975_v0 = vmov 0.0   ;;  %v2976_v1 = vmov 0   ;;  %v381_v2 = vld [vmem:[%s337_s22 + $0x8] sm:$0xff]  ;;  %v383_v3 = vld [vmem:[%s337_s22 + $0x18] sm:$0xff]  ;;  %v380_v4 = vld [vmem:[%s337_s22] sm:$0xff]  ;;  %vm402_vm0 = vcmask 261120   ;;  %v498_v44 = vlaneseq }
  0x6c   : > { %2945 = vsyncadd (%p3626_p11), [#allocation6], 4294932224  ;;  %473 = vmatprep.mubr.f32.mxu0 %v2975_v0  ;;  %2806 = vset.pattern.permute.xlu0 %v2976_v1  ;;  %v2385_v5 = vpack.c.bf16 %v383_v3, %v381_v2  ;;  %v382_v6 = vld [vmem:[%s337_s22 + $0x10] sm:$0xff]  ;;  %v385_v7 = vld [vmem:[%s337_s22 + $0x28] sm:$0xff]  ;;  %s2977_s14 = smov 127   ;;  %s2978_s20 = smov 1  }
  0x6d   : > { %946 = vmatprep.mubr.f32.mxu1 %v2975_v0  ;;  %2807 = vset.pattern.permute.xlu1 %v2976_v1  ;;  %v387_v8 = vld [vmem:[%s337_s22 + $0x38] sm:$0xff]  ;;  %v2387_v9 = vpack.c.bf16 %v382_v6, %v380_v4  ;;  %v384_v11 = vld [vmem:[%s337_s22 + $0x20] sm:$0xff]  ;;  %v386_v12 = vld [vmem:[%s337_s22 + $0x30] sm:$0xff]  ;;  %s2979_s29 = smov 16   ;;  %s2980_s22 = smov 113   ;;  %v508_v47 = vshrl.u32 %v498_v44, 7 }
  0x6e   : > { %v2389_v10 = vpack.c.bf16 %v387_v8, %v385_v7  ;;  %2386 = vmatprep.subr.bf16.mxu0 %v2385_v5  ;;  %v390_v13 = vld [vmem:[%s3604_s2] sm:$0xff]  ;;  %v2391_v14 = vpack.c.bf16 %v386_v12, %v384_v11  ;;  %v391_v15 = vld [vmem:[%s3604_s2 + $0x8] sm:$0xff]  ;;  %s2981_s15 = smov 17   ;;  %s2982_s17 = smov 112   ;;  %v3308_v48 = vand.u32 127, %v498_v44  ;;  %vm556_vm2 = vcmask 130048  }
  0x6f   : > { %2388 = vmatpush1.bf16.msra.mxu0 %v2387_v9  ;;  %394 = vperm.xlu0 %2806, %v390_v13   ;;  %v388_v16 = vld [vmem:[%s3603_s1] sm:$0xff]  ;;  %v389_v17 = vld [vmem:[%s3603_s1 + $0x8] sm:$0xff]  ;;  %s2983_s16 = smov 15   ;;  %s2984_s21 = smov 111   ;;  %v3312_v51 = vsub.s32 0, %v508_v47  ;;  %v3314_v52 = vsub.s32 1, %v508_v47 }
  0x70   : > { %2390 = vmatprep.subr.bf16.mxu0 %v2389_v10  ;;  %v1533_v34 = vld [vmem:[%s3606_s4] sm:$0xff]  ;;  %v1534_v36 = vld [vmem:[%s3606_s4 + $0x8] sm:$0xff]  ;;  %vm851_vm1 = vcmp.lt.s32.totalorder %v3308_v48, 1  ;;  %v874_v9 = vld [vmem:[#allocation5 + $0x30] sm:$0xff]  ;;  %vm1061_vm3 = vcmp.lt.s32.totalorder %v3308_v48, 127  ;;  %vm531_vm4 = vcmp.lt.s32.totalorder %v3308_v48, 16 }
  0x71   : > { %v1551_v35 = vld [vmem:[%s3609_s7] sm:$0xff]  ;;  %v1552_v37 = vld [vmem:[%s3609_s7 + $0x8] sm:$0xff]  ;;  %v875_v13 = vld [vmem:[#allocation5 + $0x38] sm:$0xff]  ;;  %vm1181_vm5 = vcmp.lt.s32.totalorder %v3308_v48, 113  ;;  %vm500_vm6 = vcmp.lt.s32.totalorder %v3308_v48, 17  ;;  %vm1301_vm7 = vcmp.lt.s32.totalorder %v3308_v48, 112 }
  0x72   : > { %v2359_v53 = vld [vmem:[%s3607_s5 + $0x6] sm:$0x3]  ;;  %v2364_v12 = vld [vmem:[%s3607_s5 + $0xa] sm:$0x3]  ;;  %v505_v47 = vld [vmem:[%s3607_s5] sm:$0x3] }
  0x73   : > { %2392 = vmatpush1.bf16.msra.mxu0 %v2391_v14  ;;  %399 = vperm.xlu0 %2806, %v391_v15   ;;  %v862_v56 = vrot.slane %v2359_v53, %v3312_v51  ;;  %v866_v57 = vrot.slane %v2359_v53, %v3314_v52  ;;  %vm731_vm8 = vcmp.lt.s32.totalorder %v3308_v48, 15  ;;  %vm1421_vm9 = vcmp.lt.s32.totalorder %v3308_v48, 111  ;;  %v755_v48 = vld [vmem:[#allocation5 + $0x28] sm:$0xff]  ;;  %p3627_p0 = scmp.ne.s32.totalorder %s3622_s28, 0  ;;  %s2985_s23 = smov [#allocation8]  }
  0x74   : > { %s2898_s25 = sshll.u32 %s2985_s23, 4  ;;  %s2899_s25 = int_to_ptr.vmem [resolvable:$false] %s2898_s25 }
  0x75   : > { %s2900_s19 = scalar_lea.vmem %s2899_s25, 4096 }
  0x76   : > { %2349 = vmatmul.mubr.msk.f32.vlgmr.msra.gmra.mrb[0].mxu0 %vm402_vm0, %v388_v16  ;;  %v1072_v16 = vrot.slane %v2364_v12, %v3312_v51 }
  0x77   : > { %479 = vmatprep.mubr.f32.mxu0 %v2975_v0 }
  0x7a   : > { %2350 = vmatmul.mubr.msk.f32.gmra.mrb[2].mxu0 %vm402_vm0, %v389_v17  ;;  %v1076_v17 = vrot.slane %v2364_v12, %v3314_v52 }
  0x7b   : > { %627 = vmatprep.mubr.f32.mxu0 %v2975_v0 }
  0xee   : > { %v395_v18 = vpop.permute.xlu0 %394 }
  0xf2   : > { %v400_v23 = vpop.permute.xlu0 %399 }
 0x149   : > { %v475_v19 = vpop.f32.mrb[0].mxu0 }
 0x14a   : > { %v476_v20 = vadd.f32 %v475_v19, %v395_v18  ;;  %v477_v21 = vpop.f32.mrb[1].mxu0 }
 0x14b   : > { %v478_v24 = vadd.f32 %v477_v21, %v395_v18  ;;  %v2351_v18 = vld [vmem:[%s3607_s5 + $0x2] sm:$0x3] }
 0x14c   : > { %v3238_v22 = vmax.f32 %v476_v20, 0.0  ;;  %v964_v21 = vld [vmem:[#allocation5 + $0x40] sm:$0xff] }
 0x14d   : > { %v481_v25 = vpop.f32.mrb[2].mxu0  ;;  %v3245_v30 = vmax.f32 %v478_v24, 0.0 }
 0x14e   : > { %v482_v26 = vadd.f32 %v481_v25, %v400_v23  ;;  %v483_v27 = vpop.f32.mrb[3].mxu0  ;;  %1053 = vrot.lane.b32.xlu0 %v3238_v22, %s2977_s14  ;;  %843 = vrot.lane.b32.xlu1 %v3238_v22, %s2978_s20 }
 0x14f   : > { %v484_v28 = vadd.f32 %v483_v27, %v400_v23  ;;  %v546_v23 = vrot.slane %v2351_v18, %v3314_v52 }
 0x150   : > { %v3243_v29 = vmax.f32 %v482_v26, 0.0 }
 0x151   : > { %v3247_v31 = vmax.f32 %v484_v28, 0.0  ;;  %v2367_v28 = vld [vmem:[%s3607_s5 + $0xc] sm:$0x3] }
 0x152   : > { %523 = vrot.lane.b32.xlu0 %v3238_v22, %s2979_s29  ;;  %845 = vrot.lane.b32.xlu1 %v3243_v29, %s2978_s20  ;;  %v2411_v32 = vpack.c.bf16 %v3243_v29, %v3238_v22 }
 0x153   : > { %v2409_v33 = vpack.c.bf16 %v3247_v31, %v3245_v30 }
 0x156   : > { %1173 = vrot.lane.b32.xlu0 %v3238_v22, %s2980_s22  ;;  %1055 = vrot.lane.b32.xlu1 %v3243_v29, %s2977_s14 }
 0x15a   : > { %490 = vrot.lane.b32.xlu0 %v3238_v22, %s2981_s15  ;;  %525 = vrot.lane.b32.xlu1 %v3243_v29, %s2979_s29 }
 0x15e   : > { %847 = vrot.lane.b32.xlu0 %v3245_v30, %s2978_s20  ;;  %1175 = vrot.lane.b32.xlu1 %v3243_v29, %s2980_s22 }
 0x162   : > { %1293 = vrot.lane.b32.xlu0 %v3238_v22, %s2982_s17  ;;  %492 = vrot.lane.b32.xlu1 %v3243_v29, %s2981_s15 }
 0x166   : > { %1057 = vrot.lane.b32.xlu0 %v3245_v30, %s2977_s14  ;;  %849 = vrot.lane.b32.xlu1 %v3247_v31, %s2978_s20 }
 0x16a   : > { %527 = vrot.lane.b32.xlu0 %v3245_v30, %s2979_s29  ;;  %1295 = vrot.lane.b32.xlu1 %v3243_v29, %s2982_s17 }
 0x16e   : > { %1177 = vrot.lane.b32.xlu0 %v3245_v30, %s2980_s22  ;;  %725 = vrot.lane.b32.xlu1 %v3243_v29, %s2983_s16 }
 0x172   : > { %494 = vrot.lane.b32.xlu0 %v3245_v30, %s2981_s15  ;;  %1415 = vrot.lane.b32.xlu1 %v3243_v29, %s2984_s21 }
 0x176   : > { %1297 = vrot.lane.b32.xlu0 %v3245_v30, %s2982_s17  ;;  %1059 = vrot.lane.b32.xlu1 %v3247_v31, %s2977_s14  ;;  %s2348_s14 = sshll.u32 %s3210_s18, 7 }
 0x177   : > { %s3533_s20 = scalar_lea.vmem [#allocation8], %s2348_s14 }
 0x17a   : > { %723 = vrot.lane.b32.xlu0 %v3238_v22, %s2983_s16  ;;  %529 = vrot.lane.b32.xlu1 %v3247_v31, %s2979_s29  ;;  %s2384_s29 = sshll.u32 %s3059_s13, 11  ;;  %s2231_s13 = scalar_lea.sflag [#allocation4], %s3210_s18 }
 0x17e   : > { %727 = vrot.lane.b32.xlu0 %v3245_v30, %s2983_s16  ;;  %1179 = vrot.lane.b32.xlu1 %v3247_v31, %s2980_s22  ;;  %s2244_s22 = sshll.u32 %s3533_s20, 4  ;;  %s3554_s22 = int_to_ptr.vmem [resolvable:$true] %s2244_s22 }
 0x17f   : > { %p2901_p5 = scmp.lt.s32.totalorder %s3554_s22, %s2899_s25 }
 0x182   : > { %1413 = vrot.lane.b32.xlu0 %v3238_v22, %s2984_s21  ;;  %496 = vrot.lane.b32.xlu1 %v3247_v31, %s2981_s15  ;;  %v542_v22 = vrot.slane %v2351_v18, %v3312_v51  ;;  %v1085_v18 = vld [vmem:[#allocation5 + $0x58] sm:$0xff] }
 0x186   : > { %1417 = vrot.lane.b32.xlu0 %v3245_v30, %s2984_s21  ;;  %1299 = vrot.lane.b32.xlu1 %v3247_v31, %s2982_s17 }
 0x18a   : > { %1537 = vperm.xlu0 %2806, %v1533_v34   ;;  %729 = vrot.lane.b32.xlu1 %v3247_v31, %s2983_s16  ;;  %s3552_s16 = scalar_lea.hbm %s3611_s9, %s2384_s29 }
 0x18e   : > { %1555 = vperm.xlu0 %2806, %v1551_v35   ;;  %1419 = vrot.lane.b32.xlu1 %v3247_v31, %s2984_s21  ;;  %v965_v35 = vld [vmem:[#allocation5 + $0x48] sm:$0xff]  ;;  %s2894_s21 = scalar_lea.vmem %s3554_s22, 2048 }
 0x18f   : > { %p2895_p8 = scmp.ne.s32.totalorder %s3554_s22, %s2894_s21  ;;  %p2902_p9 = scmp.lt.s32.totalorder %s2900_s19, %s2894_s21 }
 0x191   : > { %p2896_p1 = pnand %p2895_p8, %p3627_p0  ;;  %p2903_p12 = por %p2902_p9, %p2901_p5 }
 0x192   : > { %1542 = vperm.xlu1 %2807, %v1534_v36   ;;  %v1192_v36 = vrot.slane %v2367_v28, %v3312_v51 }
 0x193   : > { %p2897_p3 = pneg %p2896_p1 }
 0x195   : > { %p2904_p2 = pnand %p2903_p12, %p2897_p3 }
 0x196   : > { %1560 = vperm.xlu1 %2807, %v1552_v37   ;;  %v1196_v37 = vrot.slane %v2367_v28, %v3314_v52 }
 0x1c0   : > { %v1054_v38 = vpop.permute.xlu0 %1053  ;;  %v844_v39 = vpop.permute.xlu1 %843 }
 0x1c4   : > { %v3298_v40 = vpop.permute.xlu0 %523  ;;  %v846_v41 = vpop.permute.xlu1 %845 }
 0x1c8   : > { %v3300_v42 = vpop.permute.xlu0 %1173  ;;  %v3302_v43 = vpop.permute.xlu1 %1055 }
 0x1cc   : > { %v3304_v45 = vpop.permute.xlu0 %490  ;;  %v3306_v46 = vpop.permute.xlu1 %525 }
 0x1d0   : > { %v848_v49 = vpop.permute.xlu0 %847  ;;  %v3310_v50 = vpop.permute.xlu1 %1175 }
 0x1d1   : > { %v852_v58 = vsel %vm851_vm1, %v844_v39, %v848_v49  ;;  %v854_v59 = vsel %vm851_vm1, %v848_v49, %v844_v39 }
 0x1d2   : > { %v869_v1 = vmul.f32 %v862_v56, %v854_v59  ;;  %v870_v3 = vmul.f32 %v866_v57, %v852_v58 }
 0x1d4   : > { %v3320_v54 = vpop.permute.xlu0 %1293  ;;  %v3322_v55 = vpop.permute.xlu1 %492 }
 0x1d8   : > { %v1058_v60 = vpop.permute.xlu0 %1057  ;;  %v850_v61 = vpop.permute.xlu1 %849 }
 0x1d9   : > { %v853_v62 = vsel %vm851_vm1, %v846_v41, %v850_v61  ;;  %v855_v63 = vsel %vm851_vm1, %v850_v61, %v846_v41  ;;  %v1062_v19 = vsel %vm1061_vm3, %v1054_v38, %v1058_v60  ;;  %v1064_v20 = vsel %vm1061_vm3, %v1058_v60, %v1054_v38 }
 0x1da   : > { %v871_v2 = vmul.f32 %v862_v56, %v855_v63  ;;  %v872_v4 = vmul.f32 %v866_v57, %v853_v62  ;;  %v1079_v26 = vmul.f32 %v1072_v16, %v1062_v19  ;;  %v1080_v27 = vmul.f32 %v1076_v17, %v1064_v20 }
 0x1dc   : > { %v528_v5 = vpop.permute.xlu0 %527  ;;  %v3326_v6 = vpop.permute.xlu1 %1295  ;;  %v2405_v7 = vpack.c.bf16 %v872_v4, %v870_v3  ;;  %v2407_v8 = vpack.c.bf16 %v871_v2, %v869_v1  ;;  %v1084_v1 = vld [vmem:[#allocation5 + $0x50] sm:$0xff]  ;;  %v514_v3 = vrot.slane %v505_v47, %v3314_v52  ;;  %v2370_v4 = vld [vmem:[%s3607_s5 + $0xe] sm:$0x3] }
 0x1dd   : > { %v532_v31 = vsel %vm531_vm4, %v3298_v40, %v528_v5 }
 0x1de   : > { %2406 = vmatprep.subr.bf16.mxu1 %v2405_v7 }
 0x1df   : > { %2408 = vmatpush1.bf16.msra.mxu1 %v2407_v8 }
 0x1e0   : > { %v1178_v10 = vpop.permute.xlu0 %1177  ;;  %2410 = vmatprep.subr.bf16.mxu1 %v2409_v33  ;;  %v3331_v11 = vpop.permute.xlu1 %725 }
 0x1e1   : > { %v1182_v56 = vsel %vm1181_vm5, %v3300_v42, %v1178_v10  ;;  %v1184_v59 = vsel %vm1181_vm5, %v1178_v10, %v3300_v42 }
 0x1e2   : > { %2360 = vmatmul.mubr.msk.f32.vlgmr.msra.gmra.mrb[0].mxu1 %vm556_vm2, %v874_v9  ;;  %v1199_v2 = vmul.f32 %v1192_v36, %v1182_v56  ;;  %v1200_v7 = vmul.f32 %v1196_v37, %v1184_v59  ;;  %v1205_v56 = vld [vmem:[#allocation5 + $0x68] sm:$0xff] }
 0x1e3   : > { %2412 = vmatpush1.bf16.msra.mxu1 %v2411_v32  ;;  %952 = vmatprep.mubr.f32.mxu1 %v2975_v0  ;;  %v534_v32 = vsel %vm531_vm4, %v528_v5, %v3298_v40  ;;  %v550_v40 = vmul.f32 %v546_v23, %v532_v31 }
 0x1e4   : > { %v3342_v14 = vpop.permute.xlu0 %494  ;;  %v3344_v15 = vpop.permute.xlu1 %1415  ;;  %v549_v44 = vmul.f32 %v542_v22, %v534_v32 }
 0x1e5   : > { %v503_v8 = vsel %vm500_vm6, %v3342_v14, %v3304_v45  ;;  %v501_v12 = vsel %vm500_vm6, %v3304_v45, %v3342_v14 }
 0x1e6   : > { %2361 = vmatmul.mubr.msk.f32.gmra.mrb[2].mxu1 %vm556_vm2, %v875_v13  ;;  %v554_v13 = vld [vmem:[#allocation5 + $0x10] sm:$0xff] }
 0x1e7   : > { %1036 = vmatprep.mubr.f32.mxu1 %v2975_v0 }
 0x1e8   : > { %v3360_v24 = vpop.permute.xlu0 %1297  ;;  %v1060_v25 = vpop.permute.xlu1 %1059 }
 0x1e9   : > { %v1063_v29 = vsel %vm1061_vm3, %v3302_v43, %v1060_v25  ;;  %v1065_v30 = vsel %vm1061_vm3, %v1060_v25, %v3302_v43  ;;  %v1302_v28 = vsel %vm1301_vm7, %v3320_v54, %v3360_v24 }
 0x1ea   : > { %v1081_v33 = vmul.f32 %v1072_v16, %v1063_v29  ;;  %v1082_v34 = vmul.f32 %v1076_v17, %v1065_v30  ;;  %2362 = vmatmul.mubr.msk.f32.vlgmr.msra.gmra.mrb[0].mxu1 %vm556_vm2, %v964_v21  ;;  %v1316_v21 = vrot.slane %v2370_v4, %v3314_v52  ;;  %v555_v29 = vld [vmem:[#allocation5 + $0x18] sm:$0xff] }
 0x1eb   : > { %1042 = vmatprep.mubr.f32.mxu1 %v2975_v0 }
 0x1ec   : > { %v2415_v38 = vpack.c.bf16 %v1081_v33, %v1079_v26  ;;  %v3382_v39 = vpop.permute.xlu0 %723  ;;  %v530_v41 = vpop.permute.xlu1 %529  ;;  %v2413_v43 = vpack.c.bf16 %v1082_v34, %v1080_v27  ;;  %v1204_v33 = vld [vmem:[#allocation5 + $0x60] sm:$0xff] }
 0x1ed   : > { %v533_v49 = vsel %vm531_vm4, %v3306_v46, %v530_v41  ;;  %v535_v53 = vsel %vm531_vm4, %v530_v41, %v3306_v46  ;;  %v510_v46 = vrot.slane %v505_v47, %v3312_v51 }
 0x1ee   : > { %v551_v57 = vmul.f32 %v542_v22, %v535_v53  ;;  %v552_v58 = vmul.f32 %v546_v23, %v533_v49  ;;  %2363 = vmatmul.mubr.msk.f32.gmra.mrb[2].mxu1 %vm556_vm2, %v965_v35  ;;  %2414 = vmatprep.subr.bf16.mxu1 %v2413_v43  ;;  %v518_v22 = vmul.f32 %v514_v3, %v501_v12  ;;  %v2356_v23 = vld [vmem:[%s3607_s5 + $0x4] sm:$0x3] }
 0x1ef   : > { %2416 = vmatpush1.bf16.msra.mxu1 %v2415_v38  ;;  %1156 = vmatprep.mubr.f32.mxu1 %v2975_v0  ;;  %v517_v20 = vmul.f32 %v510_v46, %v503_v8  ;;  %v742_v34 = vrot.slane %v2356_v23, %v3312_v51  ;;  %v746_v35 = vrot.slane %v2356_v23, %v3314_v52  ;;  %v2373_v38 = vld [vmem:[%s3607_s5 + $0x10] sm:$0x3]  ;;  %v521_v53 = vld [vmem:[#allocation5] sm:$0xff]  ;;  %v1677_v23 = vld [vmem:[#allocation7 + $0xd8] sm:$0xff] }
 0x1f0   : > { %v2395_v60 = vpack.c.bf16 %v551_v57, %v549_v44  ;;  %v728_v61 = vpop.permute.xlu0 %727  ;;  %v1180_v62 = vpop.permute.xlu1 %1179  ;;  %v2393_v63 = vpack.c.bf16 %v552_v58, %v550_v40  ;;  %v1432_v58 = vrot.slane %v2373_v38, %v3312_v51  ;;  %v1436_v59 = vrot.slane %v2373_v38, %v3314_v52  ;;  %v1725_v38 = vld [vmem:[#allocation7 + $0x258] sm:$0xff] }
 0x1f1   : > { %v1183_v42 = vsel %vm1181_vm5, %v3310_v50, %v1180_v62  ;;  %v1185_v5 = vsel %vm1181_vm5, %v1180_v62, %v3310_v50  ;;  %v1312_v50 = vrot.slane %v2370_v4, %v3312_v51  ;;  %v732_v44 = vsel %vm731_vm8, %v3382_v39, %v728_v61  ;;  %v1324_v4 = vld [vmem:[#allocation5 + $0x70] sm:$0xff] }
 0x1f2   : > { %v1201_v9 = vmul.f32 %v1192_v36, %v1183_v42  ;;  %v1202_v10 = vmul.f32 %v1196_v37, %v1185_v5  ;;  %2394 = vmatprep.subr.bf16.mxu0 %v2393_v63  ;;  %2365 = vmatmul.mubr.msk.f32.vlgmr.msra.gmra.mrb[0].mxu1 %vm556_vm2, %v1084_v1  ;;  %v734_v40 = vsel %vm731_vm8, %v728_v61, %v3382_v39 }
 0x1f3   : > { %2396 = vmatpush1.bf16.msra.mxu0 %v2395_v60  ;;  %1162 = vmatprep.mubr.f32.mxu1 %v2975_v0  ;;  %v1319_v36 = vmul.f32 %v1312_v50, %v1302_v28  ;;  %v749_v60 = vmul.f32 %v742_v34, %v734_v40  ;;  %v750_v61 = vmul.f32 %v746_v35, %v732_v44  ;;  %v1716_v44 = vld [vmem:[#allocation7 + $0x210] sm:$0xff] }
 0x1f4   : > { %v2419_v16 = vpack.c.bf16 %v1201_v9, %v1199_v2  ;;  %v497_v17 = vpop.permute.xlu1 %496  ;;  %v2417_v19 = vpack.c.bf16 %v1202_v10, %v1200_v7  ;;  %v1414_v25 = vpop.permute.xlu0 %1413  ;;  %v522_v2 = vld [vmem:[#allocation5 + $0x8] sm:$0xff]  ;;  %v1724_v40 = vld [vmem:[#allocation7 + $0x250] sm:$0xff] }
 0x1f5   : > { %v502_v45 = vsel %vm500_vm6, %v3322_v55, %v497_v17  ;;  %v504_v14 = vsel %vm500_vm6, %v497_v17, %v3322_v55  ;;  %v1304_v55 = vsel %vm1301_vm7, %v3360_v24, %v3320_v54  ;;  %v1445_v17 = vld [vmem:[#allocation5 + $0x88] sm:$0xff] }
 0x1f6   : > { %v519_v26 = vmul.f32 %v510_v46, %v504_v14  ;;  %v520_v27 = vmul.f32 %v514_v3, %v502_v45  ;;  %2352 = vmatmul.mubr.msk.f32.vlgmr.msra.gmra.mrb[4].mxu0 %vm556_vm2, %v554_v13  ;;  %2418 = vmatprep.subr.bf16.mxu1 %v2417_v19  ;;  %v1320_v37 = vmul.f32 %v1316_v21, %v1304_v55  ;;  %v754_v13 = vld [vmem:[#allocation5 + $0x20] sm:$0xff]  ;;  %v1661_v19 = vld [vmem:[#allocation7 + $0x58] sm:$0xff] }
 0x1f7   : > { %2366 = vmatmul.mubr.msk.f32.gmra.mrb[2].mxu1 %vm556_vm2, %v1085_v18  ;;  %633 = vmatprep.mubr.f32.mxu0 %v2975_v0  ;;  %v1653_v18 = vld [vmem:[#allocation7 + $0x18] sm:$0xff]  ;;  %v1660_v45 = vld [vmem:[#allocation7 + $0x50] sm:$0xff] }
 0x1f8   : > { %v2399_v30 = vpack.c.bf16 %v519_v26, %v517_v20  ;;  %2420 = vmatpush1.bf16.msra.mxu1 %v2419_v16  ;;  %v1300_v31 = vpop.permute.xlu1 %1299  ;;  %1276 = vmatprep.mubr.f32.mxu1 %v2975_v0  ;;  %v2397_v32 = vpack.c.bf16 %v520_v27, %v518_v22  ;;  %v2497_v20 = vpack.c.bf16 %v1661_v19, %v1653_v18  ;;  %v1669_v22 = vld [vmem:[#allocation7 + $0x98] sm:$0xff]  ;;  %v1668_v26 = vld [vmem:[#allocation7 + $0x90] sm:$0xff] }
 0x1f9   : > { %v1303_v54 = vsel %vm1301_vm7, %v3326_v6, %v1300_v31  ;;  %v1305_v24 = vsel %vm1301_vm7, %v1300_v31, %v3326_v6  ;;  %v1418_v6 = vpop.permute.xlu0 %1417  ;;  %v1676_v27 = vld [vmem:[#allocation7 + $0xd0] sm:$0xff]  ;;  %v1685_v55 = vld [vmem:[#allocation7 + $0x118] sm:$0xff] }
 0x1fa   : > { %v1321_v41 = vmul.f32 %v1312_v50, %v1303_v54  ;;  %v1322_v43 = vmul.f32 %v1316_v21, %v1305_v24  ;;  %2353 = vmatmul.mubr.msk.f32.gmra.mrb[6].mxu0 %vm556_vm2, %v555_v29  ;;  %2398 = vmatprep.subr.bf16.mxu0 %v2397_v32  ;;  %v1422_v51 = vsel %vm1421_vm9, %v1414_v25, %v1418_v6  ;;  %v1325_v50 = vld [vmem:[#allocation5 + $0x78] sm:$0xff]  ;;  %v1652_v21 = vld [vmem:[#allocation7 + $0x10] sm:$0xff]  ;;  %v1693_v29 = vld [vmem:[#allocation7 + $0x158] sm:$0xff] }
 0x1fb   : > { %2368 = vmatmul.mubr.msk.f32.vlgmr.msra.gmra.mrb[0].mxu1 %vm556_vm2, %v1204_v33  ;;  %2400 = vmatpush1.bf16.msra.mxu0 %v2399_v30  ;;  %v1424_v52 = vsel %vm1421_vm9, %v1418_v6, %v1414_v25  ;;  %v1439_v7 = vmul.f32 %v1432_v58, %v1422_v51  ;;  %v2499_v14 = vpack.c.bf16 %v1660_v45, %v1652_v21  ;;  %v1684_v31 = vld [vmem:[#allocation7 + $0x110] sm:$0xff]  ;;  %v1701_v33 = vld [vmem:[#allocation7 + $0x198] sm:$0xff] }
 0x1fc   : > { %v2423_v47 = vpack.c.bf16 %v1321_v41, %v1319_v36  ;;  %v730_v49 = vpop.permute.xlu1 %729  ;;  %710 = vmatprep.mubr.f32.mxu0 %v2975_v0  ;;  %v2421_v57 = vpack.c.bf16 %v1322_v43, %v1320_v37  ;;  %1282 = vmatprep.mubr.f32.mxu1 %v2975_v0  ;;  %v1440_v8 = vmul.f32 %v1436_v59, %v1424_v52  ;;  %v1692_v32 = vld [vmem:[#allocation7 + $0x150] sm:$0xff]  ;;  %v1717_v37 = vld [vmem:[#allocation7 + $0x218] sm:$0xff] }
 0x1fd   : > { %v733_v39 = vsel %vm731_vm8, %v3331_v11, %v730_v49  ;;  %v735_v46 = vsel %vm731_vm8, %v730_v49, %v3331_v11  ;;  %v2501_v25 = vpack.c.bf16 %v1677_v23, %v1669_v22  ;;  %v2503_v28 = vpack.c.bf16 %v1676_v27, %v1668_v26  ;;  %v1700_v24 = vld [vmem:[#allocation7 + $0x190] sm:$0xff]  ;;  %v1733_v6 = vld [vmem:[#allocation7 + $0x298] sm:$0xff] }
 0x1fe   : > { %v751_v62 = vmul.f32 %v742_v34, %v735_v46  ;;  %v752_v63 = vmul.f32 %v746_v35, %v733_v39  ;;  %2422 = vmatprep.subr.bf16.mxu1 %v2421_v57  ;;  %2354 = vmatmul.mubr.msk.f32.vlgmr.msra.gmra.mrb[4].mxu0 %vm556_vm2, %v521_v53  ;;  %v2505_v30 = vpack.c.bf16 %v1693_v29, %v1685_v55  ;;  %v1709_v35 = vld [vmem:[#allocation7 + $0x1d8] sm:$0xff]  ;;  %v1708_v36 = vld [vmem:[#allocation7 + $0x1d0] sm:$0xff] }
 0x1ff   : > { %2369 = vmatmul.mubr.msk.f32.gmra.mrb[2].mxu1 %vm556_vm2, %v1205_v56  ;;  %716 = vmatprep.mubr.f32.mxu0 %v2975_v0  ;;  %v2507_v34 = vpack.c.bf16 %v1692_v32, %v1684_v31  ;;  %v2509_v54 = vpack.c.bf16 %v1709_v35, %v1701_v33  ;;  %v2511_v41 = vpack.c.bf16 %v1708_v36, %v1700_v24  ;;  %v1732_v56 = vld [vmem:[#allocation7 + $0x290] sm:$0xff]  ;;  %v1837_v21 = vld [vmem:[#allocation7 + $0x5d8] sm:$0xff] }
 0x200   : > { %v2403_v1 = vpack.c.bf16 %v751_v62, %v749_v60  ;;  %2424 = vmatpush1.bf16.msra.mxu1 %v2423_v47  ;;  %v1420_v11 = vpop.permute.xlu1 %1419  ;;  %v2401_v3 = vpack.c.bf16 %v752_v63, %v750_v61  ;;  %1396 = vmatprep.mubr.f32.mxu1 %v2975_v0  ;;  %v2513_v43 = vpack.c.bf16 %v1725_v38, %v1717_v37  ;;  %v1741_v47 = vld [vmem:[#allocation7 + $0x2d8] sm:$0xff]  ;;  %v1740_v57 = vld [vmem:[#allocation7 + $0x2d0] sm:$0xff] }
 0x201   : > { %v1423_v42 = vsel %vm1421_vm9, %v3344_v15, %v1420_v11  ;;  %v1425_v5 = vsel %vm1421_vm9, %v1420_v11, %v3344_v15  ;;  %v1444_v15 = vld [vmem:[#allocation5 + $0x80] sm:$0xff]  ;;  %v2515_v49 = vpack.c.bf16 %v1724_v40, %v1716_v44  ;;  %v2517_v53 = vpack.c.bf16 %v1741_v47, %v1733_v6  ;;  %v1765_v62 = vld [vmem:[#allocation7 + $0x398] sm:$0xff] }
 0x202   : > { %v1441_v9 = vmul.f32 %v1432_v58, %v1423_v42  ;;  %v1442_v10 = vmul.f32 %v1436_v59, %v1425_v5  ;;  %2402 = vmatprep.subr.bf16.mxu0 %v2401_v3  ;;  %2355 = vmatmul.mubr.msk.f32.gmra.mrb[6].mxu0 %vm556_vm2, %v522_v2  ;;  %v1749_v58 = vld [vmem:[#allocation7 + $0x318] sm:$0xff]  ;;  %v2519_v39 = vpack.c.bf16 %v1740_v57, %v1732_v56  ;;  %v1748_v60 = vld [vmem:[#allocation7 + $0x310] sm:$0xff] }
 0x203   : > { %2371 = vmatmul.mubr.msk.f32.vlgmr.msra.gmra.mrb[0].mxu1 %vm556_vm2, %v1324_v4  ;;  %2404 = vmatpush1.bf16.msra.mxu0 %v2403_v1  ;;  %v1757_v59 = vld [vmem:[#allocation7 + $0x358] sm:$0xff]  ;;  %v1756_v61 = vld [vmem:[#allocation7 + $0x350] sm:$0xff] }
 0x204   : > { %v2427_v12 = vpack.c.bf16 %v1441_v9, %v1439_v7  ;;  %826 = vmatprep.mubr.f32.mxu0 %v2975_v0  ;;  %v2425_v16 = vpack.c.bf16 %v1442_v10, %v1440_v8  ;;  %1402 = vmatprep.mubr.f32.mxu1 %v2975_v0  ;;  %v2521_v46 = vpack.c.bf16 %v1757_v59, %v1749_v58  ;;  %v1773_v63 = vld [vmem:[#allocation7 + $0x3d8] sm:$0xff]  ;;  %v1764_v1 = vld [vmem:[#allocation7 + $0x390] sm:$0xff] }
 0x205   : > { %v2523_v51 = vpack.c.bf16 %v1756_v61, %v1748_v60  ;;  %v2525_v52 = vpack.c.bf16 %v1773_v63, %v1765_v62  ;;  %v1772_v11 = vld [vmem:[#allocation7 + $0x3d0] sm:$0xff]  ;;  %v1781_v2 = vld [vmem:[#allocation7 + $0x418] sm:$0xff] }
 0x206   : > { %2426 = vmatprep.subr.bf16.mxu1 %v2425_v16  ;;  %2357 = vmatmul.mubr.msk.f32.vlgmr.msra.gmra.mrb[4].mxu0 %vm556_vm2, %v754_v13  ;;  %v1789_v3 = vld [vmem:[#allocation7 + $0x458] sm:$0xff]  ;;  %v2527_v4 = vpack.c.bf16 %v1772_v11, %v1764_v1  ;;  %v1780_v5 = vld [vmem:[#allocation7 + $0x410] sm:$0xff] }
 0x207   : > { %2372 = vmatmul.mubr.msk.f32.gmra.mrb[2].mxu1 %vm556_vm2, %v1325_v50  ;;  %832 = vmatprep.mubr.f32.mxu0 %v2975_v0  ;;  %v2529_v42 = vpack.c.bf16 %v1789_v3, %v1781_v2  ;;  %v1788_v7 = vld [vmem:[#allocation7 + $0x450] sm:$0xff]  ;;  %v1797_v8 = vld [vmem:[#allocation7 + $0x498] sm:$0xff] }
 0x208   : > { %2428 = vmatpush1.bf16.msra.mxu1 %v2427_v12  ;;  %1516 = vmatprep.mubr.f32.mxu1 %v2975_v0  ;;  %v1805_v9 = vld [vmem:[#allocation7 + $0x4d8] sm:$0xff]  ;;  %v2531_v10 = vpack.c.bf16 %v1788_v7, %v1780_v5  ;;  %v1796_v13 = vld [vmem:[#allocation7 + $0x490] sm:$0xff]  ;;  %v1658_v5 = vld [vmem:[#allocation7 + $0x40] sm:$0xff] }
 0x209   : > { %2498 = vmatprep.subr.bf16.mxu1 %v2497_v20  ;;  %v2533_v12 = vpack.c.bf16 %v1805_v9, %v1797_v8  ;;  %v1804_v50 = vld [vmem:[#allocation7 + $0x4d0] sm:$0xff]  ;;  %v1813_v16 = vld [vmem:[#allocation7 + $0x518] sm:$0xff]  ;;  %v1667_v7 = vld [vmem:[#allocation7 + $0x88] sm:$0xff] }
 0x20a   : > { %2358 = vmatmul.mubr.msk.f32.gmra.mrb[6].mxu0 %vm556_vm2, %v755_v48  ;;  %v1821_v48 = vld [vmem:[#allocation7 + $0x558] sm:$0xff]  ;;  %v1812_v18 = vld [vmem:[#allocation7 + $0x510] sm:$0xff]  ;;  %v1675_v8 = vld [vmem:[#allocation7 + $0xc8] sm:$0xff] }
 0x20b   : > { %2374 = vmatmul.mubr.msk.f32.vlgmr.msra.gmra.mrb[0].mxu1 %vm556_vm2, %v1444_v15  ;;  %1633 = vmatprep.mubr.f32.mxu0 %v2975_v0  ;;  %v2535_v15 = vpack.c.bf16 %v1804_v50, %v1796_v13  ;;  %v1820_v19 = vld [vmem:[#allocation7 + $0x550] sm:$0xff]  ;;  %v1829_v20 = vld [vmem:[#allocation7 + $0x598] sm:$0xff]  ;;  %v1666_v13 = vld [vmem:[#allocation7 + $0x80] sm:$0xff] }
 0x20c   : > { %1522 = vmatprep.mubr.f32.mxu1 %v2975_v0  ;;  %2500 = vmatpush1.bf16.msra.mxu1 %v2499_v14  ;;  %v2539_v45 = vpack.c.bf16 %v1820_v19, %v1812_v18  ;;  %v2541_v14 = vpack.c.bf16 %v1837_v21, %v1829_v20  ;;  %v1828_v22 = vld [vmem:[#allocation7 + $0x590] sm:$0xff]  ;;  %v1853_v26 = vld [vmem:[#allocation7 + $0x658] sm:$0xff]  ;;  %v1674_v50 = vld [vmem:[#allocation7 + $0xc0] sm:$0xff] }
 0x20d   : > { %2502 = vmatprep.subr.bf16.mxu1 %v2501_v25  ;;  %v1836_v23 = vld [vmem:[#allocation7 + $0x5d0] sm:$0xff]  ;;  %v1845_v25 = vld [vmem:[#allocation7 + $0x618] sm:$0xff]  ;;  %v1682_v19 = vld [vmem:[#allocation7 + $0x100] sm:$0xff] }
 0x20e   : > { %v2543_v27 = vpack.c.bf16 %v1836_v23, %v1828_v22  ;;  %v1844_v55 = vld [vmem:[#allocation7 + $0x610] sm:$0xff]  ;;  %v1869_v31 = vld [vmem:[#allocation7 + $0x6d8] sm:$0xff]  ;;  %v1690_v20 = vld [vmem:[#allocation7 + $0x140] sm:$0xff] }
 0x20f   : > { %2375 = vmatmul.mubr.msk.f32.gmra.mrb[2].mxu1 %vm556_vm2, %v1445_v17  ;;  %v2537_v17 = vpack.c.bf16 %v1821_v48, %v1813_v16  ;;  %v1852_v29 = vld [vmem:[#allocation7 + $0x650] sm:$0xff]  ;;  %v1885_v24 = vld [vmem:[#allocation7 + $0x758] sm:$0xff]  ;;  %v1683_v16 = vld [vmem:[#allocation7 + $0x108] sm:$0xff] }
 0x210   : > { %2504 = vmatpush1.bf16.msra.mxu1 %v2503_v28  ;;  %v2545_v28 = vpack.c.bf16 %v1853_v26, %v1845_v25  ;;  %v2547_v32 = vpack.c.bf16 %v1852_v29, %v1844_v55  ;;  %v1868_v35 = vld [vmem:[#allocation7 + $0x6d0] sm:$0xff]  ;;  %v1691_v48 = vld [vmem:[#allocation7 + $0x148] sm:$0xff]  ;;  %v1698_v23 = vld [vmem:[#allocation7 + $0x180] sm:$0xff] }
 0x211   : > { %2506 = vmatprep.subr.bf16.mxu1 %v2505_v30  ;;  %v1861_v30 = vld [vmem:[#allocation7 + $0x698] sm:$0xff]  ;;  %v1876_v38 = vld [vmem:[#allocation7 + $0x710] sm:$0xff]  ;;  %v1543_v60 = vpop.permute.xlu1 %1542  ;;  %v2441_v18 = vpack.c.bf16 %v1691_v48, %v1683_v16  ;;  %v1699_v21 = vld [vmem:[#allocation7 + $0x188] sm:$0xff] }
 0x212   : > { %v2549_v33 = vpack.c.bf16 %v1869_v31, %v1861_v30  ;;  %v1549_v9 = vld [vmem:[%s3608_s6] sm:$0xff]  ;;  %v1715_v25 = vld [vmem:[#allocation7 + $0x208] sm:$0xff]  ;;  %v1714_v55 = vld [vmem:[#allocation7 + $0x200] sm:$0xff] }
 0x213   : > { %v1723_v26 = vld [vmem:[#allocation7 + $0x248] sm:$0xff]  ;;  %v1722_v29 = vld [vmem:[#allocation7 + $0x240] sm:$0xff] }
 0x214   : > { %2508 = vmatpush1.bf16.msra.mxu1 %v2507_v34  ;;  %v1860_v34 = vld [vmem:[#allocation7 + $0x690] sm:$0xff]  ;;  %v1731_v30 = vld [vmem:[#allocation7 + $0x288] sm:$0xff]  ;;  %v1842_v48 = vld [vmem:[#allocation7 + $0x600] sm:$0xff] }
 0x215   : > { %2510 = vmatprep.subr.bf16.mxu1 %v2509_v54  ;;  %v1877_v54 = vld [vmem:[#allocation7 + $0x718] sm:$0xff]  ;;  %v2551_v36 = vpack.c.bf16 %v1868_v35, %v1860_v34  ;;  %v1739_v31 = vld [vmem:[#allocation7 + $0x2c8] sm:$0xff]  ;;  %v1730_v34 = vld [vmem:[#allocation7 + $0x280] sm:$0xff] }
 0x216   : > { %v2553_v37 = vpack.c.bf16 %v1885_v24, %v1877_v54  ;;  %v1738_v35 = vld [vmem:[#allocation7 + $0x2c0] sm:$0xff]  ;;  %v1747_v54 = vld [vmem:[#allocation7 + $0x308] sm:$0xff] }
 0x217   : > { %v1755_v24 = vld [vmem:[#allocation7 + $0x348] sm:$0xff] }
 0x218   : > { %2512 = vmatpush1.bf16.msra.mxu1 %v2511_v41  ;;  %v1884_v41 = vld [vmem:[#allocation7 + $0x750] sm:$0xff] }
 0x219   : > { %2514 = vmatprep.subr.bf16.mxu1 %v2513_v43  ;;  %v2555_v43 = vpack.c.bf16 %v1884_v41, %v1876_v38  ;;  %v1746_v38 = vld [vmem:[#allocation7 + $0x300] sm:$0xff] }
 0x21a   : > { %v1754_v41 = vld [vmem:[#allocation7 + $0x340] sm:$0xff] }
 0x21c   : > { %2516 = vmatpush1.bf16.msra.mxu1 %v2515_v49 }
 0x21d   : > { %2518 = vmatprep.subr.bf16.mxu1 %v2517_v53 }
 0x220   : > { %2520 = vmatpush1.bf16.msra.mxu1 %v2519_v39 }
 0x221   : > { %2522 = vmatprep.subr.bf16.mxu1 %v2521_v46  ;;  %v1538_v46 = vpop.permute.xlu0 %1537 }
 0x224   : > { %2524 = vmatpush1.bf16.msra.mxu1 %v2523_v51  ;;  %v1651_v51 = vld [vmem:[#allocation7 + $0x8] sm:$0xff] }
 0x225   : > { %2526 = vmatprep.subr.bf16.mxu1 %v2525_v52  ;;  %v1659_v52 = vld [vmem:[#allocation7 + $0x48] sm:$0xff] }
 0x228   : > { %2528 = vmatpush1.bf16.msra.mxu1 %v2527_v4  ;;  %v2433_v4 = vpack.c.bf16 %v1659_v52, %v1651_v51  ;;  %v1802_v51 = vld [vmem:[#allocation7 + $0x4c0] sm:$0xff]  ;;  %v1811_v52 = vld [vmem:[#allocation7 + $0x508] sm:$0xff] }
 0x229   : > { %2530 = vmatprep.subr.bf16.mxu1 %v2529_v42  ;;  %v1650_v42 = vld [vmem:[#allocation7] sm:$0xff] }
 0x22c   : > { %2532 = vmatpush1.bf16.msra.mxu1 %v2531_v10  ;;  %v2435_v10 = vpack.c.bf16 %v1658_v5, %v1650_v42  ;;  %v1827_v42 = vld [vmem:[#allocation7 + $0x588] sm:$0xff] }
 0x22d   : > { %2534 = vmatprep.subr.bf16.mxu1 %v2533_v12  ;;  %v2437_v12 = vpack.c.bf16 %v1675_v8, %v1667_v7  ;;  %v1835_v5 = vld [vmem:[#allocation7 + $0x5c8] sm:$0xff] }
 0x22e   : > { %v2477_v8 = vpack.c.bf16 %v1835_v5, %v1827_v42 }
 0x230   : > { %2536 = vmatpush1.bf16.msra.mxu1 %v2535_v15  ;;  %v1550_v15 = vld [vmem:[%s3608_s6 + $0x8] sm:$0xff] }
 0x231   : > { %2538 = vmatprep.subr.bf16.mxu1 %v2537_v17  ;;  %v2439_v17 = vpack.c.bf16 %v1674_v50, %v1666_v13  ;;  %v1851_v13 = vld [vmem:[#allocation7 + $0x648] sm:$0xff] }
 0x234   : > { %2540 = vmatpush1.bf16.msra.mxu1 %v2539_v45  ;;  %v1707_v45 = vld [vmem:[#allocation7 + $0x1c8] sm:$0xff] }
 0x235   : > { %2542 = vmatprep.subr.bf16.mxu1 %v2541_v14  ;;  %v2443_v14 = vpack.c.bf16 %v1690_v20, %v1682_v19  ;;  %v2445_v22 = vpack.c.bf16 %v1707_v45, %v1699_v21  ;;  %v1858_v21 = vld [vmem:[#allocation7 + $0x680] sm:$0xff] }
 0x236   : > { %v1866_v45 = vld [vmem:[#allocation7 + $0x6c0] sm:$0xff] }
 0x238   : > { %2544 = vmatpush1.bf16.msra.mxu1 %v2543_v27 }
 0x239   : > { %2546 = vmatprep.subr.bf16.mxu1 %v2545_v28  ;;  %v2449_v28 = vpack.c.bf16 %v1723_v26, %v1715_v25  ;;  %v1874_v25 = vld [vmem:[#allocation7 + $0x700] sm:$0xff] }
 0x23a   : > { %v1882_v26 = vld [vmem:[#allocation7 + $0x740] sm:$0xff] }
 0x23c   : > { %2548 = vmatpush1.bf16.msra.mxu1 %v2547_v32  ;;  %v2451_v32 = vpack.c.bf16 %v1722_v29, %v1714_v55  ;;  %v1899_v55 = vld [vmem:[#allocation7 + $0x7c8] sm:$0xff]  ;;  %v1893_v29 = vld [vmem:[#allocation7 + $0x798] sm:$0xff] }
 0x23d   : > { %2550 = vmatprep.subr.bf16.mxu1 %v2549_v33  ;;  %v2453_v33 = vpack.c.bf16 %v1739_v31, %v1731_v30  ;;  %v1901_v31 = vld [vmem:[#allocation7 + $0x7d8] sm:$0xff] }
 0x240   : > { %2552 = vmatpush1.bf16.msra.mxu1 %v2551_v36  ;;  %v2455_v36 = vpack.c.bf16 %v1738_v35, %v1730_v34  ;;  %v2557_v34 = vpack.c.bf16 %v1901_v31, %v1893_v29  ;;  %v1702_v29 = vld [vmem:[#allocation7 + $0x1a0] sm:$0xff] }
 0x241   : > { %2554 = vmatprep.subr.bf16.mxu1 %v2553_v37  ;;  %v2457_v37 = vpack.c.bf16 %v1755_v24, %v1747_v54  ;;  %v1892_v54 = vld [vmem:[#allocation7 + $0x790] sm:$0xff] }
 0x242   : > { %v1900_v24 = vld [vmem:[#allocation7 + $0x7d0] sm:$0xff] }
 0x244   : > { %2556 = vmatpush1.bf16.msra.mxu1 %v2555_v43  ;;  %v1763_v43 = vld [vmem:[#allocation7 + $0x388] sm:$0xff] }
 0x245   : > { %2558 = vmatprep.subr.bf16.mxu1 %v2557_v34  ;;  %v1712_v34 = vld [vmem:[#allocation7 + $0x1f0] sm:$0xff] }
 0x2d9   : > { %v828_v44 = vpop.f32.mrb[4].mxu0 }
 0x2da   : > { %v830_v40 = vpop.f32.mrb[5].mxu0 }
 0x2dd   : > { %v834_v6 = vpop.f32.mrb[6].mxu0 }
 0x2de   : > { %v1518_v47 = vpop.f32.mrb[0].mxu1  ;;  %v836_v53 = vpop.f32.mrb[7].mxu0 }
 0x2df   : > { %v2689_v49 = vadd.f32 %v1518_v47, %v828_v44  ;;  %v1520_v56 = vpop.f32.mrb[1].mxu1  ;;  %v1771_v44 = vld [vmem:[#allocation7 + $0x3c8] sm:$0xff]  ;;  %v1762_v47 = vld [vmem:[#allocation7 + $0x380] sm:$0xff] }
 0x2e0   : > { %v2690_v57 = vadd.f32 %v1520_v56, %v830_v40  ;;  %v2459_v40 = vpack.c.bf16 %v1754_v41, %v1746_v38  ;;  %v1787_v56 = vld [vmem:[#allocation7 + $0x448] sm:$0xff]  ;;  %v1657_v41 = vld [vmem:[#allocation7 + $0x38] sm:$0xff] }
 0x2e1   : > { %v1545_v62 = vadd.f32 %v2689_v49, %v1538_v46  ;;  %v1770_v49 = vld [vmem:[#allocation7 + $0x3c0] sm:$0xff]  ;;  %v1663_v38 = vld [vmem:[#allocation7 + $0x68] sm:$0xff] }
 0x2e2   : > { %v1524_v58 = vpop.f32.mrb[2].mxu1  ;;  %v1546_v1 = vadd.f32 %v2690_v57, %v1538_v46  ;;  %v2463_v57 = vpack.c.bf16 %v1770_v49, %v1762_v47  ;;  %v1795_v46 = vld [vmem:[#allocation7 + $0x488] sm:$0xff]  ;;  %v1654_v49 = vld [vmem:[#allocation7 + $0x20] sm:$0xff] }
 0x2e3   : > { %v2691_v59 = vadd.f32 %v1524_v58, %v834_v6  ;;  %v1526_v39 = vpop.f32.mrb[3].mxu1  ;;  %v2461_v6 = vpack.c.bf16 %v1771_v44, %v1763_v43  ;;  %v1665_v44 = vld [vmem:[#allocation7 + $0x78] sm:$0xff] }
 0x2e4   : > { %v2692_v61 = vadd.f32 %v1526_v39, %v836_v53  ;;  %v1779_v53 = vld [vmem:[#allocation7 + $0x408] sm:$0xff]  ;;  %v1786_v39 = vld [vmem:[#allocation7 + $0x440] sm:$0xff] }
 0x2e5   : > { %v1547_v63 = vadd.f32 %v2691_v59, %v1543_v60  ;;  %v2465_v58 = vpack.c.bf16 %v1787_v56, %v1779_v53  ;;  %v1778_v59 = vld [vmem:[#allocation7 + $0x400] sm:$0xff] }
 0x2e6   : > { %v1548_v11 = vadd.f32 %v2692_v61, %v1543_v60  ;;  %v1803_v60 = vld [vmem:[#allocation7 + $0x4c8] sm:$0xff]  ;;  %v2467_v61 = vpack.c.bf16 %v1786_v39, %v1778_v59  ;;  %v1662_v53 = vld [vmem:[#allocation7 + $0x60] sm:$0xff]  ;;  %v1664_v59 = vld [vmem:[#allocation7 + $0x70] sm:$0xff] }
 0x2e7   : > { %v2431_v2 = vpack.c.bf16 %v1547_v63, %v1545_v62  ;;  %v2469_v62 = vpack.c.bf16 %v1803_v60, %v1795_v46  ;;  %v1794_v63 = vld [vmem:[#allocation7 + $0x480] sm:$0xff]  ;;  %v1671_v39 = vld [vmem:[#allocation7 + $0xa8] sm:$0xff] }
 0x2e8   : > { %v2429_v3 = vpack.c.bf16 %v1548_v11, %v1546_v1  ;;  %v1819_v1 = vld [vmem:[#allocation7 + $0x548] sm:$0xff]  ;;  %v2471_v11 = vpack.c.bf16 %v1802_v51, %v1794_v63  ;;  %v1561_v63 = vpop.permute.xlu1 %1560 }
 0x2e9   : > { %v1679_v60 = vld [vmem:[#allocation7 + $0xe8] sm:$0xff] }
 0x2ea   : > { %2430 = vmatprep.subr.bf16.mxu0 %v2429_v3  ;;  %v1810_v3 = vld [vmem:[#allocation7 + $0x500] sm:$0xff]  ;;  %v2565_v5 = vpack.c.bf16 %v1679_v60, %v1671_v39 }
 0x2eb   : > { %2432 = vmatpush1.bf16.msra.mxu0 %v2431_v2  ;;  %v2473_v2 = vpack.c.bf16 %v1819_v1, %v1811_v52  ;;  %v2563_v1 = vpack.c.bf16 %v1662_v53, %v1654_v49  ;;  %v1735_v49 = vld [vmem:[#allocation7 + $0x2a8] sm:$0xff]  ;;  %v1734_v39 = vld [vmem:[#allocation7 + $0x2a0] sm:$0xff] }
 0x2ec   : > { %2434 = vmatprep.subr.bf16.mxu0 %v2433_v4  ;;  %v1818_v4 = vld [vmem:[#allocation7 + $0x540] sm:$0xff]  ;;  %v1743_v53 = vld [vmem:[#allocation7 + $0x2e8] sm:$0xff] }
 0x2ed   : > { %v2475_v7 = vpack.c.bf16 %v1818_v4, %v1810_v3  ;;  %v2581_v60 = vpack.c.bf16 %v1743_v53, %v1735_v49  ;;  %v1823_v49 = vld [vmem:[#allocation7 + $0x568] sm:$0xff]  ;;  %v1817_v53 = vld [vmem:[#allocation7 + $0x538] sm:$0xff] }
 0x2ee   : > { %2376 = vmatmul.mubr.msk.f32.vlgmr.msra.gmra.mrb[8].mxu0 %vm556_vm2, %v1549_v9  ;;  %v1826_v9 = vld [vmem:[#allocation7 + $0x580] sm:$0xff] }
 0x2ef   : > { %1639 = vmatprep.mubr.f32.mxu0 %v2975_v0  ;;  %2436 = vmatpush1.bf16.msra.mxu0 %v2435_v10  ;;  %v1706_v0 = vld [vmem:[#allocation7 + $0x1c0] sm:$0xff] }
 0x2f0   : > { %2438 = vmatprep.subr.bf16.mxu0 %v2437_v12  ;;  %v2447_v27 = vpack.c.bf16 %v1706_v0, %v1698_v23  ;;  %v1834_v10 = vld [vmem:[#allocation7 + $0x5c0] sm:$0xff]  ;;  %v1843_v12 = vld [vmem:[#allocation7 + $0x608] sm:$0xff]  ;;  %v2487_v23 = vpack.c.bf16 %v1866_v45, %v1858_v21  ;;  %v1688_v45 = vld [vmem:[#allocation7 + $0x130] sm:$0xff] }
 0x2f1   : > { %v2479_v50 = vpack.c.bf16 %v1834_v10, %v1826_v9  ;;  %v2481_v16 = vpack.c.bf16 %v1851_v13, %v1843_v12  ;;  %v1672_v9 = vld [vmem:[#allocation7 + $0xb0] sm:$0xff]  ;;  %v1687_v13 = vld [vmem:[#allocation7 + $0x128] sm:$0xff] }
 0x2f2   : > { %2377 = vmatmul.mubr.msk.f32.gmra.mrb[10].mxu0 %vm556_vm2, %v1550_v15  ;;  %v1850_v15 = vld [vmem:[#allocation7 + $0x640] sm:$0xff]  ;;  %v1680_v10 = vld [vmem:[#allocation7 + $0xf0] sm:$0xff] }
 0x2f3   : > { %2440 = vmatpush1.bf16.msra.mxu0 %v2439_v17  ;;  %v1859_v17 = vld [vmem:[#allocation7 + $0x688] sm:$0xff]  ;;  %v2483_v19 = vpack.c.bf16 %v1850_v15, %v1842_v48  ;;  %v1697_v48 = vld [vmem:[#allocation7 + $0x178] sm:$0xff] }
 0x2f4   : > { %2442 = vmatprep.subr.bf16.mxu0 %v2441_v18  ;;  %v1867_v18 = vld [vmem:[#allocation7 + $0x6c8] sm:$0xff] }
 0x2f5   : > { %v2485_v20 = vpack.c.bf16 %v1867_v18, %v1859_v17  ;;  %v2631_v18 = vpack.c.bf16 %v1680_v10, %v1672_v9  ;;  %v1752_v9 = vld [vmem:[#allocation7 + $0x330] sm:$0xff] }
 0x2f6   : > { %v1760_v10 = vld [vmem:[#allocation7 + $0x370] sm:$0xff] }
 0x2f7   : > { %2444 = vmatpush1.bf16.msra.mxu0 %v2443_v14  ;;  %v1875_v14 = vld [vmem:[#allocation7 + $0x708] sm:$0xff] }
 0x2f8   : > { %2446 = vmatprep.subr.bf16.mxu0 %v2445_v22  ;;  %v1883_v22 = vld [vmem:[#allocation7 + $0x748] sm:$0xff] }
 0x2f9   : > { %v2489_v0 = vpack.c.bf16 %v1883_v22, %v1875_v14  ;;  %v1696_v14 = vld [vmem:[#allocation7 + $0x170] sm:$0xff]  ;;  %v1703_v22 = vld [vmem:[#allocation7 + $0x1a8] sm:$0xff] }
 0x2fb   : > { %2448 = vmatpush1.bf16.msra.mxu0 %v2447_v27  ;;  %v2491_v27 = vpack.c.bf16 %v1882_v26, %v1874_v25  ;;  %v1711_v25 = vld [vmem:[#allocation7 + $0x1e8] sm:$0xff]  ;;  %v1705_v26 = vld [vmem:[#allocation7 + $0x1b8] sm:$0xff] }
 0x2fc   : > { %2450 = vmatprep.subr.bf16.mxu0 %v2449_v28  ;;  %v1891_v28 = vld [vmem:[#allocation7 + $0x788] sm:$0xff]  ;;  %v2573_v31 = vpack.c.bf16 %v1711_v25, %v1703_v22  ;;  %v1776_v22 = vld [vmem:[#allocation7 + $0x3f0] sm:$0xff]  ;;  %v1785_v25 = vld [vmem:[#allocation7 + $0x438] sm:$0xff] }
 0x2fd   : > { %v2493_v30 = vpack.c.bf16 %v1899_v55, %v1891_v28  ;;  %v2635_v55 = vpack.c.bf16 %v1696_v14, %v1688_v45  ;;  %v1768_v14 = vld [vmem:[#allocation7 + $0x3b0] sm:$0xff] }
 0x2ff   : > { %2452 = vmatpush1.bf16.msra.mxu0 %v2451_v32  ;;  %v1890_v32 = vld [vmem:[#allocation7 + $0x780] sm:$0xff] }
 0x300   : > { %2454 = vmatprep.subr.bf16.mxu0 %v2453_v33  ;;  %v1898_v33 = vld [vmem:[#allocation7 + $0x7c0] sm:$0xff] }
 0x301   : > { %v2495_v35 = vpack.c.bf16 %v1898_v33, %v1890_v32  ;;  %v1704_v33 = vld [vmem:[#allocation7 + $0x1b0] sm:$0xff] }
 0x303   : > { %2456 = vmatpush1.bf16.msra.mxu0 %v2455_v36  ;;  %v2559_v36 = vpack.c.bf16 %v1900_v24, %v1892_v54  ;;  %v1727_v54 = vld [vmem:[#allocation7 + $0x268] sm:$0xff]  ;;  %v1721_v24 = vld [vmem:[#allocation7 + $0x238] sm:$0xff] }
 0x304   : > { %2458 = vmatprep.subr.bf16.mxu0 %v2457_v37  ;;  %v1655_v37 = vld [vmem:[#allocation7 + $0x28] sm:$0xff] }
 0x305   : > { %2560 = vmatpush1.bf16.msra.mxu1 %v2559_v36  ;;  %v2561_v43 = vpack.c.bf16 %v1663_v38, %v1655_v37  ;;  %v1729_v36 = vld [vmem:[#allocation7 + $0x278] sm:$0xff]  ;;  %v2639_v38 = vpack.c.bf16 %v1712_v34, %v1704_v33  ;;  %v1792_v33 = vld [vmem:[#allocation7 + $0x470] sm:$0xff]  ;;  %v1799_v34 = vld [vmem:[#allocation7 + $0x4a8] sm:$0xff] }
 0x307   : > { %2460 = vmatpush1.bf16.msra.mxu0 %v2459_v40  ;;  %v2625_v40 = vpack.c.bf16 %v1665_v44, %v1657_v41  ;;  %v1718_v41 = vld [vmem:[#allocation7 + $0x220] sm:$0xff] }
 0x308   : > { %2462 = vmatprep.subr.bf16.mxu0 %v2461_v6  ;;  %v1556_v6 = vpop.permute.xlu0 %1555 }
 0x309   : > { %2626 = vmatprep.subr.bf16.mxu1 %v2625_v40  ;;  %v2641_v40 = vpack.c.bf16 %v1729_v36, %v1721_v24  ;;  %v1809_v24 = vld [vmem:[#allocation7 + $0x4f8] sm:$0xff] }
 0x30b   : > { %2464 = vmatpush1.bf16.msra.mxu0 %v2463_v57 }
 0x30c   : > { %2466 = vmatprep.subr.bf16.mxu0 %v2465_v58  ;;  %v1656_v58 = vld [vmem:[#allocation7 + $0x30] sm:$0xff] }
 0x30f   : > { %2468 = vmatpush1.bf16.msra.mxu0 %v2467_v61  ;;  %v1673_v61 = vld [vmem:[#allocation7 + $0xb8] sm:$0xff] }
 0x310   : > { %2470 = vmatprep.subr.bf16.mxu0 %v2469_v62  ;;  %v1681_v62 = vld [vmem:[#allocation7 + $0xf8] sm:$0xff] }
 0x313   : > { %2472 = vmatpush1.bf16.msra.mxu0 %v2471_v11  ;;  %v2627_v11 = vpack.c.bf16 %v1664_v59, %v1656_v58 }
 0x314   : > { %2474 = vmatprep.subr.bf16.mxu0 %v2473_v2  ;;  %v1670_v2 = vld [vmem:[#allocation7 + $0xa0] sm:$0xff] }
 0x317   : > { %2476 = vmatpush1.bf16.msra.mxu0 %v2475_v7  ;;  %v2629_v7 = vpack.c.bf16 %v1681_v62, %v1673_v61  ;;  %v1736_v62 = vld [vmem:[#allocation7 + $0x2b0] sm:$0xff] }
 0x318   : > { %2478 = vmatprep.subr.bf16.mxu0 %v2477_v8  ;;  %v1678_v8 = vld [vmem:[#allocation7 + $0xe0] sm:$0xff] }
 0x319   : > { %v2567_v17 = vpack.c.bf16 %v1678_v8, %v1670_v2 }
 0x31b   : > { %2480 = vmatpush1.bf16.msra.mxu0 %v2479_v50  ;;  %v1695_v50 = vld [vmem:[#allocation7 + $0x168] sm:$0xff] }
 0x31c   : > { %2482 = vmatprep.subr.bf16.mxu0 %v2481_v16  ;;  %v1689_v16 = vld [vmem:[#allocation7 + $0x138] sm:$0xff] }
 0x31f   : > { %2484 = vmatpush1.bf16.msra.mxu0 %v2483_v19  ;;  %v1686_v19 = vld [vmem:[#allocation7 + $0x120] sm:$0xff] }
 0x320   : > { %2486 = vmatprep.subr.bf16.mxu0 %v2485_v20  ;;  %v1694_v20 = vld [vmem:[#allocation7 + $0x160] sm:$0xff] }
 0x321   : > { %v2571_v28 = vpack.c.bf16 %v1694_v20, %v1686_v19  ;;  %v1774_v19 = vld [vmem:[#allocation7 + $0x3e0] sm:$0xff] }
 0x323   : > { %2488 = vmatpush1.bf16.msra.mxu0 %v2487_v23  ;;  %v2569_v23 = vpack.c.bf16 %v1695_v50, %v1687_v13  ;;  %v1775_v13 = vld [vmem:[#allocation7 + $0x3e8] sm:$0xff]  ;;  %v1769_v50 = vld [vmem:[#allocation7 + $0x3b8] sm:$0xff] }
 0x324   : > { %2490 = vmatprep.subr.bf16.mxu0 %v2489_v0  ;;  %v2633_v0 = vpack.c.bf16 %v1697_v48, %v1689_v16  ;;  %v1777_v16 = vld [vmem:[#allocation7 + $0x3f8] sm:$0xff] }
 0x325   : > { %v2653_v45 = vpack.c.bf16 %v1777_v16, %v1769_v50  ;;  %v1857_v50 = vld [vmem:[#allocation7 + $0x678] sm:$0xff] }
 0x327   : > { %2492 = vmatpush1.bf16.msra.mxu0 %v2491_v27  ;;  %v1713_v27 = vld [vmem:[#allocation7 + $0x1f8] sm:$0xff] }
 0x328   : > { %2494 = vmatprep.subr.bf16.mxu0 %v2493_v30  ;;  %v1710_v30 = vld [vmem:[#allocation7 + $0x1e0] sm:$0xff]  ;;  %v2637_v32 = vpack.c.bf16 %v1713_v27, %v1705_v26  ;;  %v1793_v26 = vld [vmem:[#allocation7 + $0x478] sm:$0xff] }
 0x329   : > { %v2575_v37 = vpack.c.bf16 %v1710_v30, %v1702_v29  ;;  %v1790_v29 = vld [vmem:[#allocation7 + $0x460] sm:$0xff] }
 0x32b   : > { %2496 = vmatpush1.bf16.msra.mxu0 %v2495_v35  ;;  %v1719_v35 = vld [vmem:[#allocation7 + $0x228] sm:$0xff] }
 0x32c   : > { %2562 = vmatprep.subr.bf16.mxu0 %v2561_v43  ;;  %v1726_v43 = vld [vmem:[#allocation7 + $0x260] sm:$0xff]  ;;  %v2577_v44 = vpack.c.bf16 %v1727_v54, %v1719_v35  ;;  %v1807_v35 = vld [vmem:[#allocation7 + $0x4e8] sm:$0xff]  ;;  %v1801_v54 = vld [vmem:[#allocation7 + $0x4b8] sm:$0xff] }
 0x32d   : > { %v2579_v58 = vpack.c.bf16 %v1726_v43, %v1718_v41  ;;  %v1806_v41 = vld [vmem:[#allocation7 + $0x4e0] sm:$0xff]  ;;  %v2597_v43 = vpack.c.bf16 %v1807_v35, %v1799_v34  ;;  %v1887_v34 = vld [vmem:[#allocation7 + $0x768] sm:$0xff]  ;;  %v1881_v35 = vld [vmem:[#allocation7 + $0x738] sm:$0xff] }
 0x3c1   : > { %v1635_v47 = vpop.f32.mrb[8].mxu0 }
 0x3c2   : > { %v1636_v56 = vadd.f32 %v1635_v47, %v1556_v6  ;;  %v1637_v57 = vpop.f32.mrb[9].mxu0  ;;  %v1728_v47 = vld [vmem:[#allocation7 + $0x270] sm:$0xff] }
 0x3c3   : > { %v1638_v46 = vadd.f32 %v1637_v57, %v1556_v6  ;;  %v1720_v6 = vld [vmem:[#allocation7 + $0x230] sm:$0xff]  ;;  %v1745_v57 = vld [vmem:[#allocation7 + $0x2f8] sm:$0xff] }
 0x3c4   : > { %v3514_v3 = vmax.f32 %v1636_v56, 0.0  ;;  %v1737_v56 = vld [vmem:[#allocation7 + $0x2b8] sm:$0xff]  ;;  %v2643_v59 = vpack.c.bf16 %v1728_v47, %v1720_v6  ;;  %v1808_v6 = vld [vmem:[#allocation7 + $0x4f0] sm:$0xff]  ;;  %v1815_v47 = vld [vmem:[#allocation7 + $0x528] sm:$0xff] }
 0x3c5   : > { %v1647_v51 = vmax.f32 %v1638_v46, 0.0  ;;  %v1641_v52 = vpop.f32.mrb[10].mxu0  ;;  %v1742_v46 = vld [vmem:[#allocation7 + $0x2e0] sm:$0xff]  ;;  %v2645_v61 = vpack.c.bf16 %v1745_v57, %v1737_v56  ;;  %v1825_v56 = vld [vmem:[#allocation7 + $0x578] sm:$0xff] }
 0x3c6   : > { %v1642_v4 = vadd.f32 %v1641_v52, %v1561_v63  ;;  %v1643_v42 = vpop.f32.mrb[11].mxu0  ;;  %v1759_v52 = vld [vmem:[#allocation7 + $0x368] sm:$0xff]  ;;  %v2583_v2 = vpack.c.bf16 %v1742_v46, %v1734_v39  ;;  %v1822_v39 = vld [vmem:[#allocation7 + $0x560] sm:$0xff]  ;;  %v2601_v46 = vpack.c.bf16 %v1823_v49, %v1815_v47  ;;  %v1897_v49 = vld [vmem:[#allocation7 + $0x7b8] sm:$0xff] }
 0x3c7   : > { %v1644_v12 = vadd.f32 %v1643_v42, %v1561_v63  ;;  %1970 = vmatprep.mubr.f32.mxu0 %v1647_v51  ;;  %2047 = vmatprep.mubr.f32.mxu1 %v1647_v51  ;;  %v1744_v63 = vld [vmem:[#allocation7 + $0x2f0] sm:$0xff]  ;;  %v1750_v42 = vld [vmem:[#allocation7 + $0x320] sm:$0xff]  ;;  %v1903_v47 = vld [vmem:[#allocation7 + $0x7e8] sm:$0xff] }
 0x3c8   : > { %1971 = vmatmul.mubr.f32.vlgmr.msra.gmra.mrb[12].mxu0 %v3514_v3  ;;  %2048 = vmatmul.mubr.f32.vlgmr.msra.gmra.mrb[4].mxu1 %v3514_v3  ;;  %v3520_v21 = vmax.f32 %v1642_v4, 0.0  ;;  %v2647_v4 = vpack.c.bf16 %v1744_v63, %v1736_v62  ;;  %v1824_v62 = vld [vmem:[#allocation7 + $0x570] sm:$0xff]  ;;  %v1831_v63 = vld [vmem:[#allocation7 + $0x5a8] sm:$0xff] }
 0x3c9   : > { %v3518_v15 = vmax.f32 %v1644_v12, 0.0  ;;  %2564 = vmatpush1.bf16.msra.mxu0 %v2563_v1  ;;  %2628 = vmatpush1.bf16.msra.mxu1 %v2627_v11  ;;  %v1753_v1 = vld [vmem:[#allocation7 + $0x338] sm:$0xff]  ;;  %v1767_v12 = vld [vmem:[#allocation7 + $0x3a8] sm:$0xff] }
 0x3ca   : > { %2566 = vmatprep.subr.bf16.mxu0 %v2565_v5  ;;  %2630 = vmatprep.subr.bf16.mxu1 %v2629_v7  ;;  %v1761_v11 = vld [vmem:[#allocation7 + $0x378] sm:$0xff]  ;;  %v1758_v5 = vld [vmem:[#allocation7 + $0x360] sm:$0xff]  ;;  %v2589_v20 = vpack.c.bf16 %v1775_v13, %v1767_v12  ;;  %v1855_v12 = vld [vmem:[#allocation7 + $0x668] sm:$0xff] }
 0x3cb   : > { %1976 = vmatprep.mubr.f32.mxu0 %v3518_v15  ;;  %2053 = vmatprep.mubr.f32.mxu1 %v3518_v15  ;;  %v2649_v8 = vpack.c.bf16 %v1761_v11, %v1753_v1  ;;  %v2587_v48 = vpack.c.bf16 %v1758_v5, %v1750_v42  ;;  %v1841_v1 = vld [vmem:[#allocation7 + $0x5f8] sm:$0xff]  ;;  %v1838_v42 = vld [vmem:[#allocation7 + $0x5e0] sm:$0xff] }
 0x3cc   : > { %1977 = vmatmul.mubr.f32.gmra.mrb[14].mxu0 %v3520_v21  ;;  %2054 = vmatmul.mubr.f32.gmra.mrb[6].mxu1 %v3520_v21  ;;  %v1849_v13 = vld [vmem:[#allocation7 + $0x638] sm:$0xff] }
 0x3cd   : > { %2568 = vmatpush1.bf16.msra.mxu0 %v2567_v17  ;;  %2632 = vmatpush1.bf16.msra.mxu1 %v2631_v18  ;;  %v2651_v17 = vpack.c.bf16 %v1760_v10, %v1752_v9  ;;  %v1766_v18 = vld [vmem:[#allocation7 + $0x3a0] sm:$0xff]  ;;  %v1840_v9 = vld [vmem:[#allocation7 + $0x5f0] sm:$0xff]  ;;  %v1847_v10 = vld [vmem:[#allocation7 + $0x628] sm:$0xff] }
 0x3ce   : > { %2124 = vmatprep.mubr.f32.mxu0 %v1647_v51  ;;  %2201 = vmatprep.mubr.f32.mxu1 %v1647_v51  ;;  %v1751_v51 = vld [vmem:[#allocation7 + $0x328] sm:$0xff]  ;;  %v2591_v27 = vpack.c.bf16 %v1774_v19, %v1766_v18  ;;  %v1854_v18 = vld [vmem:[#allocation7 + $0x660] sm:$0xff]  ;;  %v2609_v19 = vpack.c.bf16 %v1855_v12, %v1847_v10 }
 0x3cf   : > { %2570 = vmatprep.subr.bf16.mxu0 %v2569_v23  ;;  %2634 = vmatprep.subr.bf16.mxu1 %v2633_v0  ;;  %v2585_v7 = vpack.c.bf16 %v1759_v52, %v1751_v51  ;;  %v1783_v23 = vld [vmem:[#allocation7 + $0x428] sm:$0xff]  ;;  %v1833_v52 = vld [vmem:[#allocation7 + $0x5b8] sm:$0xff] }
 0x3d0   : > { %v1791_v0 = vld [vmem:[#allocation7 + $0x468] sm:$0xff] }
 0x3d1   : > { %2572 = vmatpush1.bf16.msra.mxu0 %v2571_v28  ;;  %2636 = vmatpush1.bf16.msra.mxu1 %v2635_v55  ;;  %v2655_v28 = vpack.c.bf16 %v1776_v22, %v1768_v14  ;;  %v1782_v55 = vld [vmem:[#allocation7 + $0x420] sm:$0xff]  ;;  %v2593_v30 = vpack.c.bf16 %v1791_v0, %v1783_v23  ;;  %v1839_v51 = vld [vmem:[#allocation7 + $0x5e8] sm:$0xff]  ;;  %v1856_v14 = vld [vmem:[#allocation7 + $0x670] sm:$0xff] }
 0x3d2   : > { %2574 = vmatprep.subr.bf16.mxu0 %v2573_v31  ;;  %2638 = vmatprep.subr.bf16.mxu1 %v2637_v32  ;;  %v2657_v31 = vpack.c.bf16 %v1793_v26, %v1785_v25  ;;  %v1784_v32 = vld [vmem:[#allocation7 + $0x430] sm:$0xff]  ;;  %v2595_v36 = vpack.c.bf16 %v1790_v29, %v1782_v55  ;;  %v2605_v5 = vpack.c.bf16 %v1839_v51, %v1831_v63  ;;  %v1863_v22 = vld [vmem:[#allocation7 + $0x6a8] sm:$0xff]  ;;  %v1865_v0 = vld [vmem:[#allocation7 + $0x6b8] sm:$0xff] }
 0x3d3   : > { %v1871_v23 = vld [vmem:[#allocation7 + $0x6e8] sm:$0xff]  ;;  %v1873_v25 = vld [vmem:[#allocation7 + $0x6f8] sm:$0xff]  ;;  %v1870_v55 = vld [vmem:[#allocation7 + $0x6e0] sm:$0xff] }
 0x3d4   : > { %v2613_v29 = vpack.c.bf16 %v1871_v23, %v1863_v22 }
 0x3d5   : > { %2576 = vmatpush1.bf16.msra.mxu0 %v2575_v37  ;;  %2640 = vmatpush1.bf16.msra.mxu1 %v2639_v38  ;;  %v2659_v37 = vpack.c.bf16 %v1792_v33, %v1784_v32  ;;  %v1798_v38 = vld [vmem:[#allocation7 + $0x4a0] sm:$0xff]  ;;  %v1872_v32 = vld [vmem:[#allocation7 + $0x6f0] sm:$0xff]  ;;  %v1879_v33 = vld [vmem:[#allocation7 + $0x728] sm:$0xff] }
 0x3d6   : > { %2578 = vmatprep.subr.bf16.mxu0 %v2577_v44  ;;  %2642 = vmatprep.subr.bf16.mxu1 %v2641_v40  ;;  %v2661_v44 = vpack.c.bf16 %v1809_v24, %v1801_v54  ;;  %v1800_v40 = vld [vmem:[#allocation7 + $0x4b0] sm:$0xff]  ;;  %v2599_v57 = vpack.c.bf16 %v1806_v41, %v1798_v38  ;;  %v1889_v54 = vld [vmem:[#allocation7 + $0x778] sm:$0xff]  ;;  %v1886_v38 = vld [vmem:[#allocation7 + $0x760] sm:$0xff]  ;;  %v2617_v41 = vpack.c.bf16 %v1887_v34, %v1879_v33 }
 0x3d9   : > { %2580 = vmatpush1.bf16.msra.mxu0 %v2579_v58  ;;  %2644 = vmatpush1.bf16.msra.mxu1 %v2643_v59  ;;  %v2663_v58 = vpack.c.bf16 %v1808_v6, %v1800_v40  ;;  %v1814_v59 = vld [vmem:[#allocation7 + $0x520] sm:$0xff]  ;;  %v1888_v40 = vld [vmem:[#allocation7 + $0x770] sm:$0xff]  ;;  %v1895_v6 = vld [vmem:[#allocation7 + $0x7a8] sm:$0xff] }
 0x3da   : > { %2582 = vmatprep.subr.bf16.mxu0 %v2581_v60  ;;  %2646 = vmatprep.subr.bf16.mxu1 %v2645_v61  ;;  %v2665_v60 = vpack.c.bf16 %v1825_v56, %v1817_v53  ;;  %v1816_v61 = vld [vmem:[#allocation7 + $0x530] sm:$0xff]  ;;  %v2603_v11 = vpack.c.bf16 %v1822_v39, %v1814_v59  ;;  %v1905_v53 = vld [vmem:[#allocation7 + $0x7f8] sm:$0xff]  ;;  %v2621_v59 = vpack.c.bf16 %v1903_v47, %v1895_v6 }
 0x3db   : > { %v2685_v39 = vpack.c.bf16 %v1905_v53, %v1897_v49 }
 0x3dd   : > { %2584 = vmatpush1.bf16.msra.mxu0 %v2583_v2  ;;  %2648 = vmatpush1.bf16.msra.mxu1 %v2647_v4  ;;  %v2667_v2 = vpack.c.bf16 %v1824_v62, %v1816_v61  ;;  %v1830_v4 = vld [vmem:[#allocation7 + $0x5a0] sm:$0xff]  ;;  %v1904_v61 = vld [vmem:[#allocation7 + $0x7f0] sm:$0xff] }
 0x3de   : > { %2586 = vmatprep.subr.bf16.mxu0 %v2585_v7  ;;  %2650 = vmatprep.subr.bf16.mxu1 %v2649_v8  ;;  %v2669_v7 = vpack.c.bf16 %v1841_v1, %v1833_v52  ;;  %v1832_v8 = vld [vmem:[#allocation7 + $0x5b0] sm:$0xff]  ;;  %v2607_v16 = vpack.c.bf16 %v1838_v42, %v1830_v4 }
 0x3e1   : > { %2588 = vmatpush1.bf16.msra.mxu0 %v2587_v48  ;;  %2652 = vmatpush1.bf16.msra.mxu1 %v2651_v17  ;;  %v2671_v48 = vpack.c.bf16 %v1840_v9, %v1832_v8  ;;  %v1846_v17 = vld [vmem:[#allocation7 + $0x620] sm:$0xff] }
 0x3e2   : > { %2590 = vmatprep.subr.bf16.mxu0 %v2589_v20  ;;  %2654 = vmatprep.subr.bf16.mxu1 %v2653_v45  ;;  %v2673_v20 = vpack.c.bf16 %v1857_v50, %v1849_v13  ;;  %v1848_v45 = vld [vmem:[#allocation7 + $0x630] sm:$0xff]  ;;  %v2611_v26 = vpack.c.bf16 %v1854_v18, %v1846_v17 }
 0x3e5   : > { %2592 = vmatpush1.bf16.msra.mxu0 %v2591_v27  ;;  %2656 = vmatpush1.bf16.msra.mxu1 %v2655_v28  ;;  %v2675_v27 = vpack.c.bf16 %v1856_v14, %v1848_v45  ;;  %v1862_v28 = vld [vmem:[#allocation7 + $0x6a0] sm:$0xff] }
 0x3e6   : > { %2594 = vmatprep.subr.bf16.mxu0 %v2593_v30  ;;  %2658 = vmatprep.subr.bf16.mxu1 %v2657_v31  ;;  %v2677_v30 = vpack.c.bf16 %v1873_v25, %v1865_v0  ;;  %v1864_v31 = vld [vmem:[#allocation7 + $0x6b0] sm:$0xff]  ;;  %v2615_v24 = vpack.c.bf16 %v1870_v55, %v1862_v28 }
 0x3e9   : > { %2596 = vmatpush1.bf16.msra.mxu0 %v2595_v36  ;;  %2660 = vmatpush1.bf16.msra.mxu1 %v2659_v37  ;;  %v2679_v36 = vpack.c.bf16 %v1872_v32, %v1864_v31  ;;  %v1878_v37 = vld [vmem:[#allocation7 + $0x720] sm:$0xff] }
 0x3ea   : > { %2598 = vmatprep.subr.bf16.mxu0 %v2597_v43  ;;  %2662 = vmatprep.subr.bf16.mxu1 %v2661_v44  ;;  %v2681_v43 = vpack.c.bf16 %v1889_v54, %v1881_v35  ;;  %v1880_v44 = vld [vmem:[#allocation7 + $0x730] sm:$0xff]  ;;  %v2619_v56 = vpack.c.bf16 %v1886_v38, %v1878_v37 }
 0x3ed   : > { %2600 = vmatpush1.bf16.msra.mxu0 %v2599_v57  ;;  %2664 = vmatpush1.bf16.msra.mxu1 %v2663_v58  ;;  %v2683_v57 = vpack.c.bf16 %v1888_v40, %v1880_v44  ;;  %v1894_v58 = vld [vmem:[#allocation7 + $0x7a0] sm:$0xff] }
 0x3ee   : > { %2602 = vmatprep.subr.bf16.mxu0 %v2601_v46  ;;  %2666 = vmatprep.subr.bf16.mxu1 %v2665_v60  ;;  %v1902_v46 = vld [vmem:[#allocation7 + $0x7e0] sm:$0xff]  ;;  %v1896_v60 = vld [vmem:[#allocation7 + $0x7b0] sm:$0xff] }
 0x3ef   : > { %v2623_v62 = vpack.c.bf16 %v1902_v46, %v1894_v58  ;;  %v2687_v63 = vpack.c.bf16 %v1904_v61, %v1896_v60 }
 0x3f1   : > { %2604 = vmatpush1.bf16.msra.mxu0 %v2603_v11  ;;  %2668 = vmatpush1.bf16.msra.mxu1 %v2667_v2 }
 0x3f2   : > { %2606 = vmatprep.subr.bf16.mxu0 %v2605_v5  ;;  %2670 = vmatprep.subr.bf16.mxu1 %v2669_v7 }
 0x3f5   : > { %2608 = vmatpush1.bf16.msra.mxu0 %v2607_v16  ;;  %2672 = vmatpush1.bf16.msra.mxu1 %v2671_v48 }
 0x3f6   : > { %2610 = vmatprep.subr.bf16.mxu0 %v2609_v19  ;;  %2674 = vmatprep.subr.bf16.mxu1 %v2673_v20 }
 0x3f9   : > { %2612 = vmatpush1.bf16.msra.mxu0 %v2611_v26  ;;  %2676 = vmatpush1.bf16.msra.mxu1 %v2675_v27 }
 0x3fa   : > { %2614 = vmatprep.subr.bf16.mxu0 %v2613_v29  ;;  %2678 = vmatprep.subr.bf16.mxu1 %v2677_v30 }
 0x3fd   : > { %2616 = vmatpush1.bf16.msra.mxu0 %v2615_v24  ;;  %2680 = vmatpush1.bf16.msra.mxu1 %v2679_v36 }
 0x3fe   : > { %2618 = vmatprep.subr.bf16.mxu0 %v2617_v41  ;;  %2682 = vmatprep.subr.bf16.mxu1 %v2681_v43 }
 0x401   : > { %2620 = vmatpush1.bf16.msra.mxu0 %v2619_v56  ;;  %2684 = vmatpush1.bf16.msra.mxu1 %v2683_v57 }
 0x402   : > { %2622 = vmatprep.subr.bf16.mxu0 %v2621_v59  ;;  %2686 = vmatprep.subr.bf16.mxu1 %v2685_v39 }
 0x405   : > { %2624 = vmatpush1.bf16.msra.mxu0 %v2623_v62  ;;  %2688 = vmatpush1.bf16.msra.mxu1 %v2687_v63 }
 0x408   : > { %2125 = vmatmul.mubr.f32.vlgmr.msra.gmra.mrb[16].mxu0 %v3514_v3  ;;  %2202 = vmatmul.mubr.f32.vlgmr.msra.gmra.mrb[8].mxu1 %v3514_v3 }
 0x409   : > { %2130 = vmatprep.mubr.f32.mxu0 %v3518_v15  ;;  %2207 = vmatprep.mubr.f32.mxu1 %v3518_v15 }
 0x40c   : > { %2131 = vmatmul.mubr.f32.gmra.mrb[18].mxu0 %v3520_v21  ;;  %2208 = vmatmul.mubr.f32.gmra.mrb[10].mxu1 %v3520_v21 }
 0x49b   : > { %v1972_v51 = vpop.f32.mrb[12].mxu0  ;;  %v2049_v52 = vpop.f32.mrb[4].mxu1 }
 0x49c   : > { %2214 = vst [vmem:[%s3533_s20] sm:$0xff] %v1972_v51  ;;  %2216 = vst [vmem:[%s3533_s20 + $0x10] sm:$0xff] %v2049_v52  ;;  %v1974_v3 = vpop.f32.mrb[13].mxu0  ;;  %v2051_v15 = vpop.f32.mrb[5].mxu1 }
 0x49d   : > { %2215 = vst [vmem:[%s3533_s20 + $0x8] sm:$0xff] %v1974_v3  ;;  %2217 = vst [vmem:[%s3533_s20 + $0x18] sm:$0xff] %v2051_v15 }
 0x49f   : > { %v1978_v21 = vpop.f32.mrb[14].mxu0  ;;  %v2055_v1 = vpop.f32.mrb[6].mxu1 }
 0x4a0   : > { %2222 = vst [vmem:[%s3533_s20 + $0x40] sm:$0xff] %v1978_v21  ;;  %2224 = vst [vmem:[%s3533_s20 + $0x50] sm:$0xff] %v2055_v1  ;;  %v1980_v11 = vpop.f32.mrb[15].mxu0  ;;  %v2057_v2 = vpop.f32.mrb[7].mxu1 }
 0x4a1   : > { %2223 = vst [vmem:[%s3533_s20 + $0x48] sm:$0xff] %v1980_v11  ;;  %2225 = vst [vmem:[%s3533_s20 + $0x58] sm:$0xff] %v2057_v2 }
 0x4db   : > { %v2126_v4 = vpop.f32.mrb[16].mxu0  ;;  %v2203_v42 = vpop.f32.mrb[8].mxu1 }
 0x4dc   : > { %2218 = vst [vmem:[%s3533_s20 + $0x20] sm:$0xff] %v2126_v4  ;;  %2220 = vst [vmem:[%s3533_s20 + $0x30] sm:$0xff] %v2203_v42  ;;  %v2128_v5 = vpop.f32.mrb[17].mxu0  ;;  %v2205_v7 = vpop.f32.mrb[9].mxu1 }
 0x4dd   : > { %2219 = vst [vmem:[%s3533_s20 + $0x28] sm:$0xff] %v2128_v5  ;;  %2221 = vst [vmem:[%s3533_s20 + $0x38] sm:$0xff] %v2205_v7 }
 0x4df   : > { %v2132_v8 = vpop.f32.mrb[18].mxu0  ;;  %v2209_v9 = vpop.f32.mrb[10].mxu1 }
 0x4e0   : > { %2226 = vst [vmem:[%s3533_s20 + $0x60] sm:$0xff] %v2132_v8  ;;  %2228 = vst [vmem:[%s3533_s20 + $0x70] sm:$0xff] %v2209_v9  ;;  %v2134_v10 = vpop.f32.mrb[19].mxu0  ;;  %v2211_v12 = vpop.f32.mrb[11].mxu1 }
 0x4e1   : > { %2227 = vst [vmem:[%s3533_s20 + $0x68] sm:$0xff] %v2134_v10  ;;  %2229 = vst [vmem:[%s3533_s20 + $0x78] sm:$0xff] %v2211_v12 }
 0x4e2   : > { %2907 = shalt.err (!%p2904_p2)
}
 0x4e3   : > { %s2908_s26 = scalar_lea.hbm %s3552_s16, 2048  ;;  %s2912_s29 = scalar_lea.hbm %s3611_s9, 4096 }
 0x4e4   : > { %p2909_p13 = scmp.ne.s32.totalorder %s3552_s16, %s2908_s26  ;;  %p2913_p4 = scmp.lt.u32.totalorder %s3552_s16, %s3611_s9 }
 0x4e5   : > { %p2914_p7 = scmp.lt.u32.totalorder %s2912_s29, %s2908_s26  ;;  %p2916_p8 = scmp.lt.u32.totalorder %s2908_s26, %s3552_s16 }
 0x4e6   : > { %p2910_p6 = pnand %p2909_p13, %p3627_p0 }
 0x4e7   : > { %p2915_p11 = por %p2914_p7, %p2913_p4 }
 0x4e8   : > { %p2911_p10 = pneg %p2910_p6 }
 0x4e9   : > { %p2917_p1 = por %p2916_p8, %p2915_p11 }
 0x4eb   : > { %p2918_p3 = pnand %p2917_p1, %p2911_p10 }
 0x4ed   : > { %2921 = shalt.err (!%p2918_p3)
}
 0x4ee   : > { %s2986_s21 = smov 1024   ;;  %s2987_s23 = smov 64  }
 0x4ef   : > { %2731 = dma.vmem_to_hbm [thread:$0]  (%p3627_p0), %s3554_s22, 2048, %s3552_s16, %s2231_s13, %s2986_s21, %s2986_s21, %s2987_s23  }
 0x4f0 PF: > { %s3628_s25 = sld [smem:[#allocation12_spill]]  ;;  %s2259_s19 = sand.u32 1, %s2952_s30  }
 0x4f1   : > { %p3630_p9 = scmp.ge.s32.totalorder %s2964_s12, 2  ;;  %s2260_s26 = scalar_lea.sflag [#allocation4], %s2259_s19 }
 0x4f6   : > { %p3629_p5 = scmp.ne.s32.totalorder %s3628_s25, 0 }
 0x4f8   : > { %p2745_p12 = pnand %p3630_p9, %p3629_p5 }
 0x4fa   : > { %2947 = dma.done.wait (!%p2745_p12), %s2260_s26, 2048  }
 0x4fb   : > { %2949 = vsyncadd (!%p2745_p12), %s2260_s26, 4294965248  ;;  %p23_p2 = scmp.ge.s32.totalorder %s3148_s24, 4   ;;  %s3631_s30 = smov %s2956_s10 }
 0x4fc   : > { %s3632_s10 = smov %s2960_s11  ;;  %s3633_s11 = smov %s3157_s27 }
 0x4fd   : > { %s3634_s12 = smov %s3148_s24  ;;  %25 = sbr.rel (!%p23_p2) target bundleno = 6 (0x6), region = 124 }
 0x504   :  { %2265 = vsyncpa [#allocation3], 1 }
 0x505   :  { %2267 = vsyncpa [#allocation3 + $0x1], 1 }
 0x506   :  { %2268 = vsyncpa [#allocation6], 1 }
 0x507   :  { %2269 = vsyncpa [#allocation4], 1 }
 0x508   :  { %2271 = vsyncpa [#allocation4 + $0x1], 1 }

</bundles_post_ra>
